<compile_context>
chip_gen: v7x
topology: tpu7x:2x2x1
jax: 0.10.0
libtpu: 0.0.40
codegen_flags: <defaults>
</compile_context>

<pallas_src>
import math

import jax
import jax.numpy as jnp
from jax.experimental import pallas as pl
from jax.experimental.pallas import tpu as pltpu

EDGE_PRUNING = 0.2
EPS = 1e-15
HIDDEN = 128          # Embedding_Dimension
NUM_FINE = 15         # Num_Fine
NUM_COARSE = 2        # Num_Coarse


def _round_up(v, m):
    return ((v + m - 1) // m) * m


def _pack_layout(num_fine, num_coarse):
    """Row offsets of the tiny per-graph outputs inside one lane-dense slab.

    Every sub-block starts at lane 0 and at an 8-aligned sublane offset, so all
    in-kernel stores are aligned masked stores (no lane/sublane rotation)."""
    r_adj1 = 0
    r_z = _round_up(num_fine, 8)
    r_adj2 = r_z + _round_up(num_fine, 8)
    r_loss = r_adj2 + _round_up(num_coarse, 8)
    pack_r = _round_up(r_loss + 1, 8)
    pack_c = max(128, _round_up(max(num_fine, num_coarse, 4), 128))
    return pack_r, pack_c, r_adj1, r_z, r_adj2, r_loss


# ----------------------------------------------------------------------------
# Single fused kernel: whole Net forward for `graphs_per_step` graphs per step.
# ----------------------------------------------------------------------------
def _make_net_kernel(use_mask, graphs_per_step, pack_layout, precision):
    pack_r, pack_c, r_adj1, r_z, r_adj2, r_loss = pack_layout
    C0 = (((0,), (0,)), ((), ()))      # contract the node axis of both operands

    def dot(a, b):
        return jnp.dot(a, b, precision=precision,
                       preferred_element_type=jnp.float32)

    def dotg(a, b):
        return jax.lax.dot_general(a, b, C0, precision=precision,
                                   preferred_element_type=jnp.float32)

    def graph_conv(feat, a, w_rel, b_rel, w_root):
        """DenseGraphConv (aggr='add'): lin_rel(adj @ x) + lin_root(x)."""
        return dot(dot(a, feat), w_rel) + b_rel + dot(feat, w_root)

    def dense_mincut(feat, a, s_logits, m):
        """dense_mincut_pool for one graph -> (pooled_x, norm_coarse_adj, mc, ortho)."""
        K = s_logits.shape[-1]

        # Softmax over clusters.  Exact division: s feeds the pooled features,
        # both losses and (through the coarse adjacency) the 0.2 threshold.
        smax = jnp.max(s_logits, axis=-1, keepdims=True)
        e = jnp.exp(s_logits - smax)
        s = e / jnp.sum(e, axis=-1, keepdims=True)
        if m is not None:
            feat = feat * m
            s = s * m

        xp = dotg(s, feat)          # S^T X   (K, H)
        sta = dotg(s, a)            # S^T A   (K, N)
        out_adj = dot(sta, s)       # S^T A S (K, K)

        eye = (jax.lax.broadcasted_iota(jnp.int32, (K, K), 0) ==
               jax.lax.broadcasted_iota(jnp.int32, (K, K), 1)).astype(jnp.float32)

        # MinCut loss: -trace(S^T A S) / trace(S^T D S)
        mincut_num = jnp.sum(out_adj * eye)
        d_flat = jnp.sum(a, axis=-1, keepdims=True)                 # (N, 1) degrees
        mincut_den = jnp.sum(d_flat * jnp.sum(s * s, axis=-1, keepdims=True))
        mc = -(mincut_num / mincut_den)

        # Orthogonality loss: || S^T S / ||S^T S||_F - I_K / sqrt(K) ||_F
        ss = dotg(s, s)                                             # (K, K)
        ss_norm = jnp.sqrt(jnp.sum(ss * ss))
        diff = ss / ss_norm - eye * (1.0 / math.sqrt(float(K)))
        ortho = jnp.sqrt(jnp.sum(diff * diff))

        # Zero diagonal + symmetric degree normalization.  Exact division:
        # this value is compared against the hard 0.2 pruning threshold.
        oa = out_adj * (1.0 - eye)
        d = jnp.sqrt(jnp.sum(oa, axis=-1, keepdims=True)) + EPS     # (K, 1)
        oa = oa / jnp.transpose(d) / d
        return xp, oa, mc, ortho

    def kernel(*refs):
        idx = 0
        x_ref, adj_ref = refs[0], refs[1]
        idx = 2
        mask_ref = None
        if use_mask:
            mask_ref = refs[idx]
            idx += 1
        (w1_rel, b1_rel, w1_root, p1_w, p1_b,
         w3_rel, b3_rel, w3_root, p2_w, p2_b) = [r[...] for r in refs[idx:idx + 10]]
        idx += 10
        ox_ref, s_ref, pk_ref = refs[idx:idx + 3]

        k1 = p1_w.shape[-1]
        k2 = p2_w.shape[-1]

        # Several graphs per grid step (statically unrolled; graphs_per_step
        # is small) to amortize the fixed per-step pipeline overhead at toy N.
        for b in range(graphs_per_step):
            x = x_ref[b]                              # (N, Cin) f32
            adj = adj_ref[b].astype(jnp.float32)      # int8 {0,1} -> exact f32
            m = mask_ref[b] if use_mask else None     # (N, 1) or None

            # ---- stage 1: conv1 + relu + pool1 + mincut #1 + edge pruning ----
            h1 = graph_conv(x, adj, w1_rel, b1_rel, w1_root)
            if m is not None:
                h1 = h1 * m
            h1 = jnp.maximum(h1, 0.0)                                   # F.relu
            s_logits = dot(h1, p1_w) + p1_b                             # (N, K1)
            x1, oa1, mc1, o1 = dense_mincut(h1, adj, s_logits, m)
            adj1 = jnp.where(oa1 > EDGE_PRUNING, 1.0, 0.0).astype(jnp.float32)

            # ---- stage 2: conv3 + relu + pool2 + mincut #2 (mask=None) ----
            h2 = graph_conv(x1, adj1, w3_rel, b3_rel, w3_root)
            h2 = jnp.maximum(h2, 0.0)
            z_logits = dot(h2, p2_w) + p2_b                             # (K1, K2)
            _y2, adj2, mc2, o2 = dense_mincut(h2, adj1, z_logits, None)  # y2 unused

            # ---- log_softmax(x1, -1) ----
            xmax = jnp.max(x1, axis=-1, keepdims=True)
            shifted = x1 - xmax
            lse = jnp.log(jnp.sum(jnp.exp(shifted), axis=-1, keepdims=True))

            ox_ref[b] = shifted - lse
            s_ref[b] = s_logits

            # Pack all tiny per-graph outputs into one lane-dense slab: a
            # single 128-lane output DMA stream instead of four lane-sparse
            # output tiles.  All offsets are lane-0 / 8-aligned sublanes.
            pk_ref[b] = jnp.zeros((pack_r, pack_c), jnp.float32)
            pk_ref[b, r_adj1:r_adj1 + k1, 0:k1] = adj1
            pk_ref[b, r_z:r_z + k1, 0:k2] = z_logits
            pk_ref[b, r_adj2:r_adj2 + k2, 0:k2] = adj2
            li = jax.lax.broadcasted_iota(jnp.int32, (1, 4), 1)
            pk_ref[b, r_loss:r_loss + 1, 0:4] = jnp.where(
                li == 0, mc1, jnp.where(li == 1, o1, jnp.where(li == 2, mc2, o2)))

    return kernel


# ----------------------------------------------------------------------------
# Parameters
# ----------------------------------------------------------------------------
def init_params(key, in_channels, hidden=HIDDEN, num_fine=NUM_FINE,
                num_coarse=NUM_COARSE):
    ks = jax.random.split(key, 10)

    def lin_w(k, fi, fo):
        bound = 1.0 / math.sqrt(fi)
        return jax.random.uniform(k, (fi, fo), jnp.float32, -bound, bound)

    def lin_b(k, fi, fo):
        bound = 1.0 / math.sqrt(fi)
        return jax.random.uniform(k, (1, fo), jnp.float32, -bound, bound)

    # Weights stored as (in, out) so y = x @ W + b (PyTorch stores W^T).
    return dict(
        conv1_w_rel=lin_w(ks[0], in_channels, hidden),
        conv1_b_rel=lin_b(ks[1], in_channels, hidden),
        conv1_w_root=lin_w(ks[2], in_channels, hidden),   # lin_root has no bias
        pool1_w=lin_w(ks[3], hidden, num_fine),
        pool1_b=lin_b(ks[4], hidden, num_fine),
        conv3_w_rel=lin_w(ks[5], hidden, hidden),
        conv3_b_rel=lin_b(ks[6], hidden, hidden),
        conv3_w_root=lin_w(ks[7], hidden, hidden),
        pool2_w=lin_w(ks[8], hidden, num_coarse),
        pool2_b=lin_b(ks[9], hidden, num_coarse),
    )


# ----------------------------------------------------------------------------
# Wrapper: block selection, VMEM budget, pallas_call, output unpacking.
# ----------------------------------------------------------------------------
def _graphs_per_step(B, N, Cin, H, K1, adj_bytes):
    """How many graphs to fuse into one grid step (toy-N amortization)."""
    per_graph = N * N * (adj_bytes + 4) + N * (Cin + H + K1) * 4
    bt = max(1, min(B, 8, (4 << 20) // max(per_graph, 1)))
    while B % bt:
        bt -= 1
    return bt


def _vmem_limit_bytes(bt, N, Cin, H, K1, K2, pack_r, pack_c, use_mask, adj_bytes):
    """Explicit scoped-VMEM budget (defaults are only 16 MiB v5e / 32 MiB v6e+)."""
    f32 = 4
    step_in = bt * (N * Cin * f32 + N * N * adj_bytes + (N * f32 if use_mask else 0))
    weights = (2 * Cin * H + H + H * K1 + K1 + 2 * H * H + H + H * K2 + K2) * f32
    step_out = bt * (K1 * H + N * K1 + pack_r * pack_c) * f32
    # In-kernel intermediates (the f32 adjacency upcast dominates at large N).
    interm = bt * (N * N + 2 * N * H + 2 * N * K1 + 4 * K1 * H) * f32
    est = 2 * (step_in + step_out + weights) + interm      # x2: double buffering
    est = int(est * 1.5) + (2 << 20)                       # headroom
    return max(16 << 20, min(est, 64 << 20))               # <= v7x physical VMEM


def net_forward(params, x, adj, mask=None, *, adj_is_binary=True,
                core_parallel=False, precision=None):
    """Forward pass of `Net`.

    adj_is_binary : stream the adjacency as int8 (exact for {0,1} adjacencies,
        4x less HBM traffic than f32).  Set False for weighted adjacencies.
    core_parallel : on TPU v7x (2 TensorCores/chip) split the batch grid axis
        across cores (pltpu.CORE_PARALLEL); keep False on v5e/v6e.
    precision : forwarded to every matmul; jax.lax.Precision.HIGHEST gives the
        closest parity with PyTorch f32 (near-free: the kernel is HBM-bound).
    """
    B, N, Cin = x.shape
    H = params["conv1_w_rel"].shape[1]
    K1 = params["pool1_w"].shape[1]
    K2 = params["pool2_w"].shape[1]
    use_mask = mask is not None

    adj_dtype = jnp.int8 if adj_is_binary else jnp.float32
    adj_bytes = 1 if adj_is_binary else 4
    pack_layout = _pack_layout(K1, K2)
    pack_r, pack_c, r_adj1, r_z, r_adj2, r_loss = pack_layout

    bt = _graphs_per_step(B, N, Cin, H, K1, adj_bytes)

    inputs = [x.astype(jnp.float32), adj.astype(adj_dtype)]
    in_specs = [
        pl.BlockSpec((bt, N, Cin), lambda g: (g, 0, 0)),
        pl.BlockSpec((bt, N, N), lambda g: (g, 0, 0)),
    ]
    if use_mask:
        inputs.append(mask.reshape(B, N, 1).astype(jnp.float32))
        in_specs.append(pl.BlockSpec((bt, N, 1), lambda g: (g, 0, 0)))

    weight_names = ["conv1_w_rel", "conv1_b_rel", "conv1_w_root",
                    "pool1_w", "pool1_b",
                    "conv3_w_rel", "conv3_b_rel", "conv3_w_root",
                    "pool2_w", "pool2_b"]
    for name in weight_names:
        w = params[name]
        inputs.append(w)
        in_specs.append(pl.BlockSpec(w.shape, lambda g: (0, 0)))

    out_shapes = (
        jax.ShapeDtypeStruct((B, K1, H), jnp.float32),          # log_softmax(x1)
        jax.ShapeDtypeStruct((B, N, K1), jnp.float32),          # s (raw pool1 logits)
        jax.ShapeDtypeStruct((B, pack_r, pack_c), jnp.float32),  # packed small outputs
    )
    out_specs = (
        pl.BlockSpec((bt, K1, H), lambda g: (g, 0, 0)),
        pl.BlockSpec((bt, N, K1), lambda g: (g, 0, 0)),
        pl.BlockSpec((bt, pack_r, pack_c), lambda g: (g, 0, 0)),
    )

    sem = (pltpu.CORE_PARALLEL,) if core_parallel else ("parallel",)
    vmem_limit = _vmem_limit_bytes(bt, N, Cin, H, K1, K2, pack_r, pack_c,
                                   use_mask, adj_bytes)

    outs = pl.pallas_call(
        _make_net_kernel(use_mask, bt, pack_layout, precision),
        out_shape=out_shapes,
        grid=(B // bt,),
        in_specs=in_specs,
        out_specs=out_specs,
        compiler_params=pltpu.CompilerParams(
            dimension_semantics=sem, vmem_limit_bytes=vmem_limit),
    )(*inputs)

    out_x1, s, packed = outs
    adj1 = packed[:, r_adj1:r_adj1 + K1, 0:K1]
    z = packed[:, r_z:r_z + K1, 0:K2]
    adj2 = packed[:, r_adj2:r_adj2 + K2, 0:K2]
    # torch.mean over batch -> scalar losses (tiny reductions over B elements).
    mc1 = jnp.mean(packed[:, r_loss, 0])
    o1 = jnp.mean(packed[:, r_loss, 1])
    mc2 = jnp.mean(packed[:, r_loss, 2])
    o2 = jnp.mean(packed[:, r_loss, 3])
    return out_x1, mc1, o1, mc2, o2, s, adj1, z, adj2


if __name__ == "__main__":
    B, N, IN_CHANNELS = 2, 16, 4
    key = jax.random.PRNGKey(0)
    kx, ka, kp = jax.random.split(key, 3)

    x = jax.random.normal(kx, (B, N, IN_CHANNELS), jnp.float32)
    a = jax.random.uniform(ka, (B, N, N), jnp.float32)
    a = (a + jnp.swapaxes(a, 1, 2)) * 0.5
    adj = (a > 0.5).astype(jnp.float32)
    adj = jnp.maximum(adj, jnp.eye(N, dtype=jnp.float32)[None])   # self-loops -> nonzero degrees

    params = init_params(kp, IN_CHANNELS)

    outs = jax.jit(net_forward)(params, x, adj)   # mask=None path (specialized at trace time)
    outs = jax.block_until_ready(outs)
    print("KERNEL_OK")
</pallas_src>

<mosaic_0001>
module attributes {stable_mosaic.version = 11 : i64} {
  func.func @kernel(%arg0: i32, %arg1: memref<2x16x4xf32, #tpu.memory_space<vmem>>, %arg2: memref<2x16x16xi8, #tpu.memory_space<vmem>>, %arg3: memref<4x128xf32, #tpu.memory_space<vmem>>, %arg4: memref<1x128xf32, #tpu.memory_space<vmem>>, %arg5: memref<4x128xf32, #tpu.memory_space<vmem>>, %arg6: memref<128x15xf32, #tpu.memory_space<vmem>>, %arg7: memref<1x15xf32, #tpu.memory_space<vmem>>, %arg8: memref<128x128xf32, #tpu.memory_space<vmem>>, %arg9: memref<1x128xf32, #tpu.memory_space<vmem>>, %arg10: memref<128x128xf32, #tpu.memory_space<vmem>>, %arg11: memref<128x2xf32, #tpu.memory_space<vmem>>, %arg12: memref<1x2xf32, #tpu.memory_space<vmem>>, %arg13: memref<2x15x128xf32, #tpu.memory_space<vmem>>, %arg14: memref<2x16x15xf32, #tpu.memory_space<vmem>>, %arg15: memref<2x48x128xf32, #tpu.memory_space<vmem>>) attributes {dimension_semantics = [#tpu.dimension_semantics<parallel>], iteration_bounds = array<i64: 1>, scalar_prefetch = 0 : i64, scratch_operands = 0 : i64, tpu.core_type = #tpu.core_type<tc>, window_params = [{transform_indices = @transform_0, window_bounds = array<i64: 2, 16, 4>}, {transform_indices = @transform_1, window_bounds = array<i64: 2, 16, 16>}, {pipeline_mode = #tpu.pipeline_mode<synchronous>, transform_indices = @transform_2, window_bounds = array<i64: 4, 128>}, {pipeline_mode = #tpu.pipeline_mode<synchronous>, transform_indices = @transform_3, window_bounds = array<i64: 1, 128>}, {pipeline_mode = #tpu.pipeline_mode<synchronous>, transform_indices = @transform_4, window_bounds = array<i64: 4, 128>}, {pipeline_mode = #tpu.pipeline_mode<synchronous>, transform_indices = @transform_5, window_bounds = array<i64: 128, 15>}, {pipeline_mode = #tpu.pipeline_mode<synchronous>, transform_indices = @transform_6, window_bounds = array<i64: 1, 15>}, {pipeline_mode = #tpu.pipeline_mode<synchronous>, transform_indices = @transform_7, window_bounds = array<i64: 128, 128>}, {pipeline_mode = #tpu.pipeline_mode<synchronous>, transform_indices = @transform_8, window_bounds = array<i64: 1, 128>}, {pipeline_mode = #tpu.pipeline_mode<synchronous>, transform_indices = @transform_9, window_bounds = array<i64: 128, 128>}, {pipeline_mode = #tpu.pipeline_mode<synchronous>, transform_indices = @transform_10, window_bounds = array<i64: 128, 2>}, {pipeline_mode = #tpu.pipeline_mode<synchronous>, transform_indices = @transform_11, window_bounds = array<i64: 1, 2>}, {transform_indices = @transform_12, window_bounds = array<i64: 2, 15, 128>}, {transform_indices = @transform_13, window_bounds = array<i64: 2, 16, 15>}, {transform_indices = @transform_14, window_bounds = array<i64: 2, 48, 128>}]} {
    %c0 = arith.constant 0 : index
    %c0_0 = arith.constant 0 : index
    %0 = vector.load %arg3[%c0, %c0_0] : memref<4x128xf32, #tpu.memory_space<vmem>>, vector<4x128xf32>
    %c0_1 = arith.constant 0 : index
    %c0_2 = arith.constant 0 : index
    %1 = vector.load %arg4[%c0_1, %c0_2] : memref<1x128xf32, #tpu.memory_space<vmem>>, vector<1x128xf32>
    %c0_3 = arith.constant 0 : index
    %c0_4 = arith.constant 0 : index
    %2 = vector.load %arg5[%c0_3, %c0_4] : memref<4x128xf32, #tpu.memory_space<vmem>>, vector<4x128xf32>
    %c0_5 = arith.constant 0 : index
    %c0_6 = arith.constant 0 : index
    %3 = vector.load %arg6[%c0_5, %c0_6] : memref<128x15xf32, #tpu.memory_space<vmem>>, vector<128x15xf32>
    %c0_7 = arith.constant 0 : index
    %c0_8 = arith.constant 0 : index
    %4 = vector.load %arg7[%c0_7, %c0_8] : memref<1x15xf32, #tpu.memory_space<vmem>>, vector<1x15xf32>
    %c0_9 = arith.constant 0 : index
    %c0_10 = arith.constant 0 : index
    %5 = vector.load %arg8[%c0_9, %c0_10] : memref<128x128xf32, #tpu.memory_space<vmem>>, vector<128x128xf32>
    %c0_11 = arith.constant 0 : index
    %c0_12 = arith.constant 0 : index
    %6 = vector.load %arg9[%c0_11, %c0_12] : memref<1x128xf32, #tpu.memory_space<vmem>>, vector<1x128xf32>
    %c0_13 = arith.constant 0 : index
    %c0_14 = arith.constant 0 : index
    %7 = vector.load %arg10[%c0_13, %c0_14] : memref<128x128xf32, #tpu.memory_space<vmem>>, vector<128x128xf32>
    %c0_15 = arith.constant 0 : index
    %c0_16 = arith.constant 0 : index
    %8 = vector.load %arg11[%c0_15, %c0_16] : memref<128x2xf32, #tpu.memory_space<vmem>>, vector<128x2xf32>
    %c0_17 = arith.constant 0 : index
    %c0_18 = arith.constant 0 : index
    %9 = vector.load %arg12[%c0_17, %c0_18] : memref<1x2xf32, #tpu.memory_space<vmem>>, vector<1x2xf32>
    %c0_19 = arith.constant 0 : index
    %c0_20 = arith.constant 0 : index
    %c0_21 = arith.constant 0 : index
    %10 = vector.load %arg1[%c0_19, %c0_20, %c0_21] : memref<2x16x4xf32, #tpu.memory_space<vmem>>, vector<1x16x4xf32>
    %11 = vector.shape_cast %10 : vector<1x16x4xf32> to vector<16x4xf32>
    %c0_22 = arith.constant 0 : index
    %c0_23 = arith.constant 0 : index
    %c0_24 = arith.constant 0 : index
    %12 = vector.load %arg2[%c0_22, %c0_23, %c0_24] : memref<2x16x16xi8, #tpu.memory_space<vmem>>, vector<1x16x16xi8>
    %13 = vector.shape_cast %12 : vector<1x16x16xi8> to vector<16x16xi8>
    %14 = arith.sitofp %13 : vector<16x16xi8> to vector<16x16xf32>
    %cst = arith.constant dense<0.000000e+00> : vector<16x4xf32>
    %15 = tpu.matmul %14, %11, %cst {dimension_numbers = #tpu.dot_dimension_numbers<[1], [0], [0], [1], [0, 0, 1, 1], [], []>} : vector<16x16xf32>, vector<16x4xf32>, vector<16x4xf32> -> vector<16x4xf32>
    %cst_25 = arith.constant dense<0.000000e+00> : vector<16x128xf32>
    %16 = tpu.matmul %15, %0, %cst_25 {dimension_numbers = #tpu.dot_dimension_numbers<[1], [0], [0], [1], [0, 0, 1, 1], [], []>} : vector<16x4xf32>, vector<4x128xf32>, vector<16x128xf32> -> vector<16x128xf32>
    %17 = vector.broadcast %1 : vector<1x128xf32> to vector<16x128xf32>
    %18 = arith.addf %16, %17 : vector<16x128xf32>
    %cst_26 = arith.constant dense<0.000000e+00> : vector<16x128xf32>
    %19 = tpu.matmul %11, %2, %cst_26 {dimension_numbers = #tpu.dot_dimension_numbers<[1], [0], [0], [1], [0, 0, 1, 1], [], []>} : vector<16x4xf32>, vector<4x128xf32>, vector<16x128xf32> -> vector<16x128xf32>
    %20 = arith.addf %18, %19 : vector<16x128xf32>
    %cst_27 = arith.constant 0.000000e+00 : f32
    %21 = vector.broadcast %cst_27 : f32 to vector<16x128xf32>
    %22 = arith.maximumf %20, %21 : vector<16x128xf32>
    %cst_28 = arith.constant dense<0.000000e+00> : vector<16x15xf32>
    %23 = tpu.matmul %22, %3, %cst_28 {dimension_numbers = #tpu.dot_dimension_numbers<[1], [0], [0], [1], [0, 0, 1, 1], [], []>} : vector<16x128xf32>, vector<128x15xf32>, vector<16x15xf32> -> vector<16x15xf32>
    %24 = vector.broadcast %4 : vector<1x15xf32> to vector<16x15xf32>
    %25 = arith.addf %23, %24 : vector<16x15xf32>
    %cst_29 = arith.constant dense<0xFF800000> : vector<16xf32>
    %26 = vector.multi_reduction <maximumf>, %25, %cst_29 [1] : vector<16x15xf32> to vector<16xf32>
    %27 = vector.shape_cast %26 : vector<16xf32> to vector<16x1xf32>
    %28 = vector.broadcast %27 : vector<16x1xf32> to vector<16x15xf32>
    %29 = arith.subf %25, %28 : vector<16x15xf32>
    %30 = math.exp %29 : vector<16x15xf32>
    %cst_30 = arith.constant dense<0.000000e+00> : vector<16xf32>
    %31 = vector.multi_reduction <add>, %30, %cst_30 [1] : vector<16x15xf32> to vector<16xf32>
    %32 = vector.shape_cast %31 : vector<16xf32> to vector<16x1xf32>
    %33 = vector.broadcast %32 : vector<16x1xf32> to vector<16x15xf32>
    %34 = arith.divf %30, %33 : vector<16x15xf32>
    %cst_31 = arith.constant dense<0.000000e+00> : vector<15x128xf32>
    %35 = tpu.matmul %34, %22, %cst_31 {dimension_numbers = #tpu.dot_dimension_numbers<[0], [0], [1], [1], [0, 1, 1, 1], [], []>} : vector<16x15xf32>, vector<16x128xf32>, vector<15x128xf32> -> vector<15x128xf32>
    %cst_32 = arith.constant dense<0.000000e+00> : vector<15x16xf32>
    %36 = tpu.matmul %34, %14, %cst_32 {dimension_numbers = #tpu.dot_dimension_numbers<[0], [0], [1], [1], [0, 1, 1, 1], [], []>} : vector<16x15xf32>, vector<16x16xf32>, vector<15x16xf32> -> vector<15x16xf32>
    %cst_33 = arith.constant dense<0.000000e+00> : vector<15x15xf32>
    %37 = tpu.matmul %36, %34, %cst_33 {dimension_numbers = #tpu.dot_dimension_numbers<[1], [0], [0], [1], [0, 0, 1, 1], [], []>} : vector<15x16xf32>, vector<16x15xf32>, vector<15x15xf32> -> vector<15x15xf32>
    %38 = tpu.iota {dimensions = array<i32: 0>} : vector<15x15xi32>
    %39 = tpu.iota {dimensions = array<i32: 1>} : vector<15x15xi32>
    %40 = arith.cmpi eq, %38, %39 : vector<15x15xi32>
    %41 = arith.extui %40 : vector<15x15xi1> to vector<15x15xi32>
    %42 = arith.sitofp %41 : vector<15x15xi32> to vector<15x15xf32>
    %43 = arith.mulf %37, %42 : vector<15x15xf32>
    %44 = vector.shape_cast %43 : vector<15x15xf32> to vector<1x15x15xf32>
    %cst_34 = arith.constant dense<0.000000e+00> : vector<1xf32>
    %45 = vector.multi_reduction <add>, %44, %cst_34 [1, 2] : vector<1x15x15xf32> to vector<1xf32>
    %46 = vector.shape_cast %45 : vector<1xf32> to vector<1x1x1xf32>
    %47 = vector.extract %46[0, 0, 0] : f32 from vector<1x1x1xf32>
    %cst_35 = arith.constant dense<0.000000e+00> : vector<16xf32>
    %48 = vector.multi_reduction <add>, %14, %cst_35 [1] : vector<16x16xf32> to vector<16xf32>
    %49 = vector.shape_cast %48 : vector<16xf32> to vector<16x1xf32>
    %50 = arith.mulf %34, %34 : vector<16x15xf32>
    %cst_36 = arith.constant dense<0.000000e+00> : vector<16xf32>
    %51 = vector.multi_reduction <add>, %50, %cst_36 [1] : vector<16x15xf32> to vector<16xf32>
    %52 = vector.shape_cast %51 : vector<16xf32> to vector<16x1xf32>
    %53 = arith.mulf %49, %52 : vector<16x1xf32>
    %54 = vector.shape_cast %53 : vector<16x1xf32> to vector<1x16x1xf32>
    %cst_37 = arith.constant dense<0.000000e+00> : vector<1xf32>
    %55 = vector.multi_reduction <add>, %54, %cst_37 [1, 2] : vector<1x16x1xf32> to vector<1xf32>
    %56 = vector.shape_cast %55 : vector<1xf32> to vector<1x1x1xf32>
    %57 = vector.extract %56[0, 0, 0] : f32 from vector<1x1x1xf32>
    %58 = arith.divf %47, %57 : f32
    %cst_38 = arith.constant 0.000000e+00 : f32
    %59 = arith.subf %cst_38, %58 : f32
    %cst_39 = arith.constant dense<0.000000e+00> : vector<15x15xf32>
    %60 = tpu.matmul %34, %34, %cst_39 {dimension_numbers = #tpu.dot_dimension_numbers<[0], [0], [1], [1], [0, 1, 1, 1], [], []>} : vector<16x15xf32>, vector<16x15xf32>, vector<15x15xf32> -> vector<15x15xf32>
    %61 = arith.mulf %60, %60 : vector<15x15xf32>
    %62 = vector.shape_cast %61 : vector<15x15xf32> to vector<1x15x15xf32>
    %cst_40 = arith.constant dense<0.000000e+00> : vector<1xf32>
    %63 = vector.multi_reduction <add>, %62, %cst_40 [1, 2] : vector<1x15x15xf32> to vector<1xf32>
    %64 = vector.shape_cast %63 : vector<1xf32> to vector<1x1x1xf32>
    %65 = vector.extract %64[0, 0, 0] : f32 from vector<1x1x1xf32>
    %66 = math.sqrt %65 : f32
    %67 = vector.broadcast %66 : f32 to vector<15x15xf32>
    %68 = arith.divf %60, %67 : vector<15x15xf32>
    %cst_41 = arith.constant 0.258198887 : f32
    %69 = vector.broadcast %cst_41 : f32 to vector<15x15xf32>
    %70 = arith.mulf %42, %69 : vector<15x15xf32>
    %71 = arith.subf %68, %70 : vector<15x15xf32>
    %72 = arith.mulf %71, %71 : vector<15x15xf32>
    %73 = vector.shape_cast %72 : vector<15x15xf32> to vector<1x15x15xf32>
    %cst_42 = arith.constant dense<0.000000e+00> : vector<1xf32>
    %74 = vector.multi_reduction <add>, %73, %cst_42 [1, 2] : vector<1x15x15xf32> to vector<1xf32>
    %75 = vector.shape_cast %74 : vector<1xf32> to vector<1x1x1xf32>
    %76 = vector.extract %75[0, 0, 0] : f32 from vector<1x1x1xf32>
    %77 = math.sqrt %76 : f32
    %cst_43 = arith.constant 1.000000e+00 : f32
    %78 = vector.broadcast %cst_43 : f32 to vector<15x15xf32>
    %79 = arith.subf %78, %42 : vector<15x15xf32>
    %80 = arith.mulf %37, %79 : vector<15x15xf32>
    %cst_44 = arith.constant dense<0.000000e+00> : vector<15xf32>
    %81 = vector.multi_reduction <add>, %80, %cst_44 [1] : vector<15x15xf32> to vector<15xf32>
    %82 = vector.shape_cast %81 : vector<15xf32> to vector<15x1xf32>
    %83 = math.sqrt %82 : vector<15x1xf32>
    %cst_45 = arith.constant 1.000000e-15 : f32
    %84 = vector.broadcast %cst_45 : f32 to vector<15x1xf32>
    %85 = arith.addf %83, %84 : vector<15x1xf32>
    %86 = tpu.transpose %85, [1, 0] : vector<15x1xf32> -> vector<1x15xf32>
    %87 = vector.broadcast %86 : vector<1x15xf32> to vector<15x15xf32>
    %88 = arith.divf %80, %87 : vector<15x15xf32>
    %89 = vector.broadcast %85 : vector<15x1xf32> to vector<15x15xf32>
    %90 = arith.divf %88, %89 : vector<15x15xf32>
    %cst_46 = arith.constant 2.000000e-01 : f32
    %91 = vector.broadcast %cst_46 : f32 to vector<15x15xf32>
    %92 = arith.cmpf ogt, %90, %91 : vector<15x15xf32>
    %cst_47 = arith.constant 1.000000e+00 : f32
    %cst_48 = arith.constant 0.000000e+00 : f32
    %93 = vector.broadcast %cst_47 : f32 to vector<15x15xf32>
    %94 = vector.broadcast %cst_48 : f32 to vector<15x15xf32>
    %95 = arith.select %92, %93, %94 : vector<15x15xi1>, vector<15x15xf32>
    %cst_49 = arith.constant dense<0.000000e+00> : vector<15x128xf32>
    %96 = tpu.matmul %95, %35, %cst_49 {dimension_numbers = #tpu.dot_dimension_numbers<[1], [0], [0], [1], [0, 0, 1, 1], [], []>} : vector<15x15xf32>, vector<15x128xf32>, vector<15x128xf32> -> vector<15x128xf32>
    %cst_50 = arith.constant dense<0.000000e+00> : vector<15x128xf32>
    %97 = tpu.matmul %96, %5, %cst_50 {dimension_numbers = #tpu.dot_dimension_numbers<[1], [0], [0], [1], [0, 0, 1, 1], [], []>} : vector<15x128xf32>, vector<128x128xf32>, vector<15x128xf32> -> vector<15x128xf32>
    %98 = vector.broadcast %6 : vector<1x128xf32> to vector<15x128xf32>
    %99 = arith.addf %97, %98 : vector<15x128xf32>
    %cst_51 = arith.constant dense<0.000000e+00> : vector<15x128xf32>
    %100 = tpu.matmul %35, %7, %cst_51 {dimension_numbers = #tpu.dot_dimension_numbers<[1], [0], [0], [1], [0, 0, 1, 1], [], []>} : vector<15x128xf32>, vector<128x128xf32>, vector<15x128xf32> -> vector<15x128xf32>
    %101 = arith.addf %99, %100 : vector<15x128xf32>
    %cst_52 = arith.constant 0.000000e+00 : f32
    %102 = vector.broadcast %cst_52 : f32 to vector<15x128xf32>
    %103 = arith.maximumf %101, %102 : vector<15x128xf32>
    %cst_53 = arith.constant dense<0.000000e+00> : vector<15x2xf32>
    %104 = tpu.matmul %103, %8, %cst_53 {dimension_numbers = #tpu.dot_dimension_numbers<[1], [0], [0], [1], [0, 0, 1, 1], [], []>} : vector<15x128xf32>, vector<128x2xf32>, vector<15x2xf32> -> vector<15x2xf32>
    %105 = vector.broadcast %9 : vector<1x2xf32> to vector<15x2xf32>
    %106 = arith.addf %104, %105 : vector<15x2xf32>
    %cst_54 = arith.constant dense<0xFF800000> : vector<15xf32>
    %107 = vector.multi_reduction <maximumf>, %106, %cst_54 [1] : vector<15x2xf32> to vector<15xf32>
    %108 = vector.shape_cast %107 : vector<15xf32> to vector<15x1xf32>
    %109 = vector.broadcast %108 : vector<15x1xf32> to vector<15x2xf32>
    %110 = arith.subf %106, %109 : vector<15x2xf32>
    %111 = math.exp %110 : vector<15x2xf32>
    %cst_55 = arith.constant dense<0.000000e+00> : vector<15xf32>
    %112 = vector.multi_reduction <add>, %111, %cst_55 [1] : vector<15x2xf32> to vector<15xf32>
    %113 = vector.shape_cast %112 : vector<15xf32> to vector<15x1xf32>
    %114 = vector.broadcast %113 : vector<15x1xf32> to vector<15x2xf32>
    %115 = arith.divf %111, %114 : vector<15x2xf32>
    %cst_56 = arith.constant dense<0.000000e+00> : vector<2x15xf32>
    %116 = tpu.matmul %115, %95, %cst_56 {dimension_numbers = #tpu.dot_dimension_numbers<[0], [0], [1], [1], [0, 1, 1, 1], [], []>} : vector<15x2xf32>, vector<15x15xf32>, vector<2x15xf32> -> vector<2x15xf32>
    %cst_57 = arith.constant dense<0.000000e+00> : vector<2x2xf32>
    %117 = tpu.matmul %116, %115, %cst_57 {dimension_numbers = #tpu.dot_dimension_numbers<[1], [0], [0], [1], [0, 0, 1, 1], [], []>} : vector<2x15xf32>, vector<15x2xf32>, vector<2x2xf32> -> vector<2x2xf32>
    %118 = tpu.iota {dimensions = array<i32: 0>} : vector<2x2xi32>
    %119 = tpu.iota {dimensions = array<i32: 1>} : vector<2x2xi32>
    %120 = arith.cmpi eq, %118, %119 : vector<2x2xi32>
    %121 = arith.extui %120 : vector<2x2xi1> to vector<2x2xi32>
    %122 = arith.sitofp %121 : vector<2x2xi32> to vector<2x2xf32>
    %123 = arith.mulf %117, %122 : vector<2x2xf32>
    %124 = vector.shape_cast %123 : vector<2x2xf32> to vector<1x2x2xf32>
    %cst_58 = arith.constant dense<0.000000e+00> : vector<1xf32>
    %125 = vector.multi_reduction <add>, %124, %cst_58 [1, 2] : vector<1x2x2xf32> to vector<1xf32>
    %126 = vector.shape_cast %125 : vector<1xf32> to vector<1x1x1xf32>
    %127 = vector.extract %126[0, 0, 0] : f32 from vector<1x1x1xf32>
    %cst_59 = arith.constant dense<0.000000e+00> : vector<15xf32>
    %128 = vector.multi_reduction <add>, %95, %cst_59 [1] : vector<15x15xf32> to vector<15xf32>
    %129 = vector.shape_cast %128 : vector<15xf32> to vector<15x1xf32>
    %130 = arith.mulf %115, %115 : vector<15x2xf32>
    %cst_60 = arith.constant dense<0.000000e+00> : vector<15xf32>
    %131 = vector.multi_reduction <add>, %130, %cst_60 [1] : vector<15x2xf32> to vector<15xf32>
    %132 = vector.shape_cast %131 : vector<15xf32> to vector<15x1xf32>
    %133 = arith.mulf %129, %132 : vector<15x1xf32>
    %134 = vector.shape_cast %133 : vector<15x1xf32> to vector<1x15x1xf32>
    %cst_61 = arith.constant dense<0.000000e+00> : vector<1xf32>
    %135 = vector.multi_reduction <add>, %134, %cst_61 [1, 2] : vector<1x15x1xf32> to vector<1xf32>
    %136 = vector.shape_cast %135 : vector<1xf32> to vector<1x1x1xf32>
    %137 = vector.extract %136[0, 0, 0] : f32 from vector<1x1x1xf32>
    %138 = arith.divf %127, %137 : f32
    %cst_62 = arith.constant 0.000000e+00 : f32
    %139 = arith.subf %cst_62, %138 : f32
    %cst_63 = arith.constant dense<0.000000e+00> : vector<2x2xf32>
    %140 = tpu.matmul %115, %115, %cst_63 {dimension_numbers = #tpu.dot_dimension_numbers<[0], [0], [1], [1], [0, 1, 1, 1], [], []>} : vector<15x2xf32>, vector<15x2xf32>, vector<2x2xf32> -> vector<2x2xf32>
    %141 = arith.mulf %140, %140 : vector<2x2xf32>
    %142 = vector.shape_cast %141 : vector<2x2xf32> to vector<1x2x2xf32>
    %cst_64 = arith.constant dense<0.000000e+00> : vector<1xf32>
    %143 = vector.multi_reduction <add>, %142, %cst_64 [1, 2] : vector<1x2x2xf32> to vector<1xf32>
    %144 = vector.shape_cast %143 : vector<1xf32> to vector<1x1x1xf32>
    %145 = vector.extract %144[0, 0, 0] : f32 from vector<1x1x1xf32>
    %146 = math.sqrt %145 : f32
    %147 = vector.broadcast %146 : f32 to vector<2x2xf32>
    %148 = arith.divf %140, %147 : vector<2x2xf32>
    %cst_65 = arith.constant 0.707106769 : f32
    %149 = vector.broadcast %cst_65 : f32 to vector<2x2xf32>
    %150 = arith.mulf %122, %149 : vector<2x2xf32>
    %151 = arith.subf %148, %150 : vector<2x2xf32>
    %152 = arith.mulf %151, %151 : vector<2x2xf32>
    %153 = vector.shape_cast %152 : vector<2x2xf32> to vector<1x2x2xf32>
    %cst_66 = arith.constant dense<0.000000e+00> : vector<1xf32>
    %154 = vector.multi_reduction <add>, %153, %cst_66 [1, 2] : vector<1x2x2xf32> to vector<1xf32>
    %155 = vector.shape_cast %154 : vector<1xf32> to vector<1x1x1xf32>
    %156 = vector.extract %155[0, 0, 0] : f32 from vector<1x1x1xf32>
    %157 = math.sqrt %156 : f32
    %cst_67 = arith.constant 1.000000e+00 : f32
    %158 = vector.broadcast %cst_67 : f32 to vector<2x2xf32>
    %159 = arith.subf %158, %122 : vector<2x2xf32>
    %160 = arith.mulf %117, %159 : vector<2x2xf32>
    %cst_68 = arith.constant dense<0.000000e+00> : vector<2xf32>
    %161 = vector.multi_reduction <add>, %160, %cst_68 [1] : vector<2x2xf32> to vector<2xf32>
    %162 = vector.shape_cast %161 : vector<2xf32> to vector<2x1xf32>
    %163 = math.sqrt %162 : vector<2x1xf32>
    %cst_69 = arith.constant 1.000000e-15 : f32
    %164 = vector.broadcast %cst_69 : f32 to vector<2x1xf32>
    %165 = arith.addf %163, %164 : vector<2x1xf32>
    %166 = tpu.transpose %165, [1, 0] : vector<2x1xf32> -> vector<1x2xf32>
    %167 = vector.broadcast %166 : vector<1x2xf32> to vector<2x2xf32>
    %168 = arith.divf %160, %167 : vector<2x2xf32>
    %169 = vector.broadcast %165 : vector<2x1xf32> to vector<2x2xf32>
    %170 = arith.divf %168, %169 : vector<2x2xf32>
    %cst_70 = arith.constant dense<0xFF800000> : vector<15xf32>
    %171 = vector.multi_reduction <maximumf>, %35, %cst_70 [1] : vector<15x128xf32> to vector<15xf32>
    %172 = vector.shape_cast %171 : vector<15xf32> to vector<15x1xf32>
    %173 = vector.broadcast %172 : vector<15x1xf32> to vector<15x128xf32>
    %174 = arith.subf %35, %173 : vector<15x128xf32>
    %175 = math.exp %174 : vector<15x128xf32>
    %cst_71 = arith.constant dense<0.000000e+00> : vector<15xf32>
    %176 = vector.multi_reduction <add>, %175, %cst_71 [1] : vector<15x128xf32> to vector<15xf32>
    %177 = vector.shape_cast %176 : vector<15xf32> to vector<15x1xf32>
    %178 = math.log %177 : vector<15x1xf32>
    %179 = vector.broadcast %178 : vector<15x1xf32> to vector<15x128xf32>
    %180 = arith.subf %174, %179 : vector<15x128xf32>
    %c0_72 = arith.constant 0 : index
    %c0_73 = arith.constant 0 : index
    %c0_74 = arith.constant 0 : index
    %181 = vector.load %arg13[%c0_72, %c0_73, %c0_74] : memref<2x15x128xf32, #tpu.memory_space<vmem>>, vector<1x15x128xf32>
    %182 = vector.shape_cast %181 : vector<1x15x128xf32> to vector<15x128xf32>
    %183 = vector.shape_cast %180 : vector<15x128xf32> to vector<1x15x128xf32>
    tpu.vector_store %arg13[%c0_72, %c0_73, %c0_74], %183 {strides = array<i32>} : memref<2x15x128xf32, #tpu.memory_space<vmem>>, vector<1x15x128xf32>,
    %c0_75 = arith.constant 0 : index
    %c0_76 = arith.constant 0 : index
    %c0_77 = arith.constant 0 : index
    %184 = vector.load %arg14[%c0_75, %c0_76, %c0_77] : memref<2x16x15xf32, #tpu.memory_space<vmem>>, vector<1x16x15xf32>
    %185 = vector.shape_cast %184 : vector<1x16x15xf32> to vector<16x15xf32>
    %186 = vector.shape_cast %25 : vector<16x15xf32> to vector<1x16x15xf32>
    tpu.vector_store %arg14[%c0_75, %c0_76, %c0_77], %186 {strides = array<i32>} : memref<2x16x15xf32, #tpu.memory_space<vmem>>, vector<1x16x15xf32>,
    %cst_78 = arith.constant 0.000000e+00 : f32
    %187 = vector.broadcast %cst_78 : f32 to vector<48x128xf32>
    %c0_79 = arith.constant 0 : index
    %c0_80 = arith.constant 0 : index
    %c0_81 = arith.constant 0 : index
    %188 = vector.load %arg15[%c0_79, %c0_80, %c0_81] : memref<2x48x128xf32, #tpu.memory_space<vmem>>, vector<1x48x128xf32>
    %189 = vector.shape_cast %188 : vector<1x48x128xf32> to vector<48x128xf32>
    %190 = vector.shape_cast %187 : vector<48x128xf32> to vector<1x48x128xf32>
    tpu.vector_store %arg15[%c0_79, %c0_80, %c0_81], %190 {strides = array<i32>} : memref<2x48x128xf32, #tpu.memory_space<vmem>>, vector<1x48x128xf32>,
    %c0_82 = arith.constant 0 : index
    %c0_83 = arith.constant 0 : index
    %c0_84 = arith.constant 0 : index
    %191 = vector.load %arg15[%c0_82, %c0_83, %c0_84] : memref<2x48x128xf32, #tpu.memory_space<vmem>>, vector<1x15x15xf32>
    %192 = vector.shape_cast %191 : vector<1x15x15xf32> to vector<15x15xf32>
    %193 = vector.shape_cast %95 : vector<15x15xf32> to vector<1x15x15xf32>
    tpu.vector_store %arg15[%c0_82, %c0_83, %c0_84], %193 {strides = array<i32>} : memref<2x48x128xf32, #tpu.memory_space<vmem>>, vector<1x15x15xf32>,
    %c0_85 = arith.constant 0 : index
    %c16 = arith.constant 16 : index
    %c0_86 = arith.constant 0 : index
    %194 = vector.load %arg15[%c0_85, %c16, %c0_86] : memref<2x48x128xf32, #tpu.memory_space<vmem>>, vector<1x15x2xf32>
    %195 = vector.shape_cast %194 : vector<1x15x2xf32> to vector<15x2xf32>
    %196 = vector.shape_cast %106 : vector<15x2xf32> to vector<1x15x2xf32>
    tpu.vector_store %arg15[%c0_85, %c16, %c0_86], %196 {strides = array<i32>} : memref<2x48x128xf32, #tpu.memory_space<vmem>>, vector<1x15x2xf32>,
    %c0_87 = arith.constant 0 : index
    %c32 = arith.constant 32 : index
    %c0_88 = arith.constant 0 : index
    %197 = vector.load %arg15[%c0_87, %c32, %c0_88] : memref<2x48x128xf32, #tpu.memory_space<vmem>>, vector<1x2x2xf32>
    %198 = vector.shape_cast %197 : vector<1x2x2xf32> to vector<2x2xf32>
    %199 = vector.shape_cast %170 : vector<2x2xf32> to vector<1x2x2xf32>
    tpu.vector_store %arg15[%c0_87, %c32, %c0_88], %199 {strides = array<i32>} : memref<2x48x128xf32, #tpu.memory_space<vmem>>, vector<1x2x2xf32>,
    %200 = tpu.iota {dimensions = array<i32: 1>} : vector<1x4xi32>
    %c0_i32 = arith.constant 0 : i32
    %201 = vector.broadcast %c0_i32 : i32 to vector<1x4xi32>
    %202 = arith.cmpi eq, %200, %201 : vector<1x4xi32>
    %c1_i32 = arith.constant 1 : i32
    %203 = vector.broadcast %c1_i32 : i32 to vector<1x4xi32>
    %204 = arith.cmpi eq, %200, %203 : vector<1x4xi32>
    %c2_i32 = arith.constant 2 : i32
    %205 = vector.broadcast %c2_i32 : i32 to vector<1x4xi32>
    %206 = arith.cmpi eq, %200, %205 : vector<1x4xi32>
    %207 = vector.broadcast %139 : f32 to vector<1x4xf32>
    %208 = vector.broadcast %157 : f32 to vector<1x4xf32>
    %209 = arith.select %206, %207, %208 : vector<1x4xi1>, vector<1x4xf32>
    %210 = vector.broadcast %77 : f32 to vector<1x4xf32>
    %211 = arith.select %204, %210, %209 : vector<1x4xi1>, vector<1x4xf32>
    %212 = vector.broadcast %59 : f32 to vector<1x4xf32>
    %213 = arith.select %202, %212, %211 : vector<1x4xi1>, vector<1x4xf32>
    %c0_89 = arith.constant 0 : index
    %c40 = arith.constant 40 : index
    %c0_90 = arith.constant 0 : index
    %214 = vector.load %arg15[%c0_89, %c40, %c0_90] : memref<2x48x128xf32, #tpu.memory_space<vmem>>, vector<1x1x4xf32>
    %215 = vector.shape_cast %214 : vector<1x1x4xf32> to vector<1x4xf32>
    %216 = vector.shape_cast %213 : vector<1x4xf32> to vector<1x1x4xf32>
    tpu.vector_store %arg15[%c0_89, %c40, %c0_90], %216 {strides = array<i32>} : memref<2x48x128xf32, #tpu.memory_space<vmem>>, vector<1x1x4xf32>,
    %c1 = arith.constant 1 : index
    %c0_91 = arith.constant 0 : index
    %c0_92 = arith.constant 0 : index
    %217 = vector.load %arg1[%c1, %c0_91, %c0_92] : memref<2x16x4xf32, #tpu.memory_space<vmem>>, vector<1x16x4xf32>
    %218 = vector.shape_cast %217 : vector<1x16x4xf32> to vector<16x4xf32>
    %c1_93 = arith.constant 1 : index
    %c0_94 = arith.constant 0 : index
    %c0_95 = arith.constant 0 : index
    %219 = vector.load %arg2[%c1_93, %c0_94, %c0_95] : memref<2x16x16xi8, #tpu.memory_space<vmem>>, vector<1x16x16xi8>
    %220 = vector.shape_cast %219 : vector<1x16x16xi8> to vector<16x16xi8>
    %221 = arith.sitofp %220 : vector<16x16xi8> to vector<16x16xf32>
    %cst_96 = arith.constant dense<0.000000e+00> : vector<16x4xf32>
    %222 = tpu.matmul %221, %218, %cst_96 {dimension_numbers = #tpu.dot_dimension_numbers<[1], [0], [0], [1], [0, 0, 1, 1], [], []>} : vector<16x16xf32>, vector<16x4xf32>, vector<16x4xf32> -> vector<16x4xf32>
    %cst_97 = arith.constant dense<0.000000e+00> : vector<16x128xf32>
    %223 = tpu.matmul %222, %0, %cst_97 {dimension_numbers = #tpu.dot_dimension_numbers<[1], [0], [0], [1], [0, 0, 1, 1], [], []>} : vector<16x4xf32>, vector<4x128xf32>, vector<16x128xf32> -> vector<16x128xf32>
    %224 = vector.broadcast %1 : vector<1x128xf32> to vector<16x128xf32>
    %225 = arith.addf %223, %224 : vector<16x128xf32>
    %cst_98 = arith.constant dense<0.000000e+00> : vector<16x128xf32>
    %226 = tpu.matmul %218, %2, %cst_98 {dimension_numbers = #tpu.dot_dimension_numbers<[1], [0], [0], [1], [0, 0, 1, 1], [], []>} : vector<16x4xf32>, vector<4x128xf32>, vector<16x128xf32> -> vector<16x128xf32>
    %227 = arith.addf %225, %226 : vector<16x128xf32>
    %cst_99 = arith.constant 0.000000e+00 : f32
    %228 = vector.broadcast %cst_99 : f32 to vector<16x128xf32>
    %229 = arith.maximumf %227, %228 : vector<16x128xf32>
    %cst_100 = arith.constant dense<0.000000e+00> : vector<16x15xf32>
    %230 = tpu.matmul %229, %3, %cst_100 {dimension_numbers = #tpu.dot_dimension_numbers<[1], [0], [0], [1], [0, 0, 1, 1], [], []>} : vector<16x128xf32>, vector<128x15xf32>, vector<16x15xf32> -> vector<16x15xf32>
    %231 = vector.broadcast %4 : vector<1x15xf32> to vector<16x15xf32>
    %232 = arith.addf %230, %231 : vector<16x15xf32>
    %cst_101 = arith.constant dense<0xFF800000> : vector<16xf32>
    %233 = vector.multi_reduction <maximumf>, %232, %cst_101 [1] : vector<16x15xf32> to vector<16xf32>
    %234 = vector.shape_cast %233 : vector<16xf32> to vector<16x1xf32>
    %235 = vector.broadcast %234 : vector<16x1xf32> to vector<16x15xf32>
    %236 = arith.subf %232, %235 : vector<16x15xf32>
    %237 = math.exp %236 : vector<16x15xf32>
    %cst_102 = arith.constant dense<0.000000e+00> : vector<16xf32>
    %238 = vector.multi_reduction <add>, %237, %cst_102 [1] : vector<16x15xf32> to vector<16xf32>
    %239 = vector.shape_cast %238 : vector<16xf32> to vector<16x1xf32>
    %240 = vector.broadcast %239 : vector<16x1xf32> to vector<16x15xf32>
    %241 = arith.divf %237, %240 : vector<16x15xf32>
    %cst_103 = arith.constant dense<0.000000e+00> : vector<15x128xf32>
    %242 = tpu.matmul %241, %229, %cst_103 {dimension_numbers = #tpu.dot_dimension_numbers<[0], [0], [1], [1], [0, 1, 1, 1], [], []>} : vector<16x15xf32>, vector<16x128xf32>, vector<15x128xf32> -> vector<15x128xf32>
    %cst_104 = arith.constant dense<0.000000e+00> : vector<15x16xf32>
    %243 = tpu.matmul %241, %221, %cst_104 {dimension_numbers = #tpu.dot_dimension_numbers<[0], [0], [1], [1], [0, 1, 1, 1], [], []>} : vector<16x15xf32>, vector<16x16xf32>, vector<15x16xf32> -> vector<15x16xf32>
    %cst_105 = arith.constant dense<0.000000e+00> : vector<15x15xf32>
    %244 = tpu.matmul %243, %241, %cst_105 {dimension_numbers = #tpu.dot_dimension_numbers<[1], [0], [0], [1], [0, 0, 1, 1], [], []>} : vector<15x16xf32>, vector<16x15xf32>, vector<15x15xf32> -> vector<15x15xf32>
    %245 = tpu.iota {dimensions = array<i32: 0>} : vector<15x15xi32>
    %246 = tpu.iota {dimensions = array<i32: 1>} : vector<15x15xi32>
    %247 = arith.cmpi eq, %245, %246 : vector<15x15xi32>
    %248 = arith.extui %247 : vector<15x15xi1> to vector<15x15xi32>
    %249 = arith.sitofp %248 : vector<15x15xi32> to vector<15x15xf32>
    %250 = arith.mulf %244, %249 : vector<15x15xf32>
    %251 = vector.shape_cast %250 : vector<15x15xf32> to vector<1x15x15xf32>
    %cst_106 = arith.constant dense<0.000000e+00> : vector<1xf32>
    %252 = vector.multi_reduction <add>, %251, %cst_106 [1, 2] : vector<1x15x15xf32> to vector<1xf32>
    %253 = vector.shape_cast %252 : vector<1xf32> to vector<1x1x1xf32>
    %254 = vector.extract %253[0, 0, 0] : f32 from vector<1x1x1xf32>
    %cst_107 = arith.constant dense<0.000000e+00> : vector<16xf32>
    %255 = vector.multi_reduction <add>, %221, %cst_107 [1] : vector<16x16xf32> to vector<16xf32>
    %256 = vector.shape_cast %255 : vector<16xf32> to vector<16x1xf32>
    %257 = arith.mulf %241, %241 : vector<16x15xf32>
    %cst_108 = arith.constant dense<0.000000e+00> : vector<16xf32>
    %258 = vector.multi_reduction <add>, %257, %cst_108 [1] : vector<16x15xf32> to vector<16xf32>
    %259 = vector.shape_cast %258 : vector<16xf32> to vector<16x1xf32>
    %260 = arith.mulf %256, %259 : vector<16x1xf32>
    %261 = vector.shape_cast %260 : vector<16x1xf32> to vector<1x16x1xf32>
    %cst_109 = arith.constant dense<0.000000e+00> : vector<1xf32>
    %262 = vector.multi_reduction <add>, %261, %cst_109 [1, 2] : vector<1x16x1xf32> to vector<1xf32>
    %263 = vector.shape_cast %262 : vector<1xf32> to vector<1x1x1xf32>
    %264 = vector.extract %263[0, 0, 0] : f32 from vector<1x1x1xf32>
    %265 = arith.divf %254, %264 : f32
    %cst_110 = arith.constant 0.000000e+00 : f32
    %266 = arith.subf %cst_110, %265 : f32
    %cst_111 = arith.constant dense<0.000000e+00> : vector<15x15xf32>
    %267 = tpu.matmul %241, %241, %cst_111 {dimension_numbers = #tpu.dot_dimension_numbers<[0], [0], [1], [1], [0, 1, 1, 1], [], []>} : vector<16x15xf32>, vector<16x15xf32>, vector<15x15xf32> -> vector<15x15xf32>
    %268 = arith.mulf %267, %267 : vector<15x15xf32>
    %269 = vector.shape_cast %268 : vector<15x15xf32> to vector<1x15x15xf32>
    %cst_112 = arith.constant dense<0.000000e+00> : vector<1xf32>
    %270 = vector.multi_reduction <add>, %269, %cst_112 [1, 2] : vector<1x15x15xf32> to vector<1xf32>
    %271 = vector.shape_cast %270 : vector<1xf32> to vector<1x1x1xf32>
    %272 = vector.extract %271[0, 0, 0] : f32 from vector<1x1x1xf32>
    %273 = math.sqrt %272 : f32
    %274 = vector.broadcast %273 : f32 to vector<15x15xf32>
    %275 = arith.divf %267, %274 : vector<15x15xf32>
    %cst_113 = arith.constant 0.258198887 : f32
    %276 = vector.broadcast %cst_113 : f32 to vector<15x15xf32>
    %277 = arith.mulf %249, %276 : vector<15x15xf32>
    %278 = arith.subf %275, %277 : vector<15x15xf32>
    %279 = arith.mulf %278, %278 : vector<15x15xf32>
    %280 = vector.shape_cast %279 : vector<15x15xf32> to vector<1x15x15xf32>
    %cst_114 = arith.constant dense<0.000000e+00> : vector<1xf32>
    %281 = vector.multi_reduction <add>, %280, %cst_114 [1, 2] : vector<1x15x15xf32> to vector<1xf32>
    %282 = vector.shape_cast %281 : vector<1xf32> to vector<1x1x1xf32>
    %283 = vector.extract %282[0, 0, 0] : f32 from vector<1x1x1xf32>
    %284 = math.sqrt %283 : f32
    %cst_115 = arith.constant 1.000000e+00 : f32
    %285 = vector.broadcast %cst_115 : f32 to vector<15x15xf32>
    %286 = arith.subf %285, %249 : vector<15x15xf32>
    %287 = arith.mulf %244, %286 : vector<15x15xf32>
    %cst_116 = arith.constant dense<0.000000e+00> : vector<15xf32>
    %288 = vector.multi_reduction <add>, %287, %cst_116 [1] : vector<15x15xf32> to vector<15xf32>
    %289 = vector.shape_cast %288 : vector<15xf32> to vector<15x1xf32>
    %290 = math.sqrt %289 : vector<15x1xf32>
    %cst_117 = arith.constant 1.000000e-15 : f32
    %291 = vector.broadcast %cst_117 : f32 to vector<15x1xf32>
    %292 = arith.addf %290, %291 : vector<15x1xf32>
    %293 = tpu.transpose %292, [1, 0] : vector<15x1xf32> -> vector<1x15xf32>
    %294 = vector.broadcast %293 : vector<1x15xf32> to vector<15x15xf32>
    %295 = arith.divf %287, %294 : vector<15x15xf32>
    %296 = vector.broadcast %292 : vector<15x1xf32> to vector<15x15xf32>
    %297 = arith.divf %295, %296 : vector<15x15xf32>
    %cst_118 = arith.constant 2.000000e-01 : f32
    %298 = vector.broadcast %cst_118 : f32 to vector<15x15xf32>
    %299 = arith.cmpf ogt, %297, %298 : vector<15x15xf32>
    %cst_119 = arith.constant 1.000000e+00 : f32
    %cst_120 = arith.constant 0.000000e+00 : f32
    %300 = vector.broadcast %cst_119 : f32 to vector<15x15xf32>
    %301 = vector.broadcast %cst_120 : f32 to vector<15x15xf32>
    %302 = arith.select %299, %300, %301 : vector<15x15xi1>, vector<15x15xf32>
    %cst_121 = arith.constant dense<0.000000e+00> : vector<15x128xf32>
    %303 = tpu.matmul %302, %242, %cst_121 {dimension_numbers = #tpu.dot_dimension_numbers<[1], [0], [0], [1], [0, 0, 1, 1], [], []>} : vector<15x15xf32>, vector<15x128xf32>, vector<15x128xf32> -> vector<15x128xf32>
    %cst_122 = arith.constant dense<0.000000e+00> : vector<15x128xf32>
    %304 = tpu.matmul %303, %5, %cst_122 {dimension_numbers = #tpu.dot_dimension_numbers<[1], [0], [0], [1], [0, 0, 1, 1], [], []>} : vector<15x128xf32>, vector<128x128xf32>, vector<15x128xf32> -> vector<15x128xf32>
    %305 = vector.broadcast %6 : vector<1x128xf32> to vector<15x128xf32>
    %306 = arith.addf %304, %305 : vector<15x128xf32>
    %cst_123 = arith.constant dense<0.000000e+00> : vector<15x128xf32>
    %307 = tpu.matmul %242, %7, %cst_123 {dimension_numbers = #tpu.dot_dimension_numbers<[1], [0], [0], [1], [0, 0, 1, 1], [], []>} : vector<15x128xf32>, vector<128x128xf32>, vector<15x128xf32> -> vector<15x128xf32>
    %308 = arith.addf %306, %307 : vector<15x128xf32>
    %cst_124 = arith.constant 0.000000e+00 : f32
    %309 = vector.broadcast %cst_124 : f32 to vector<15x128xf32>
    %310 = arith.maximumf %308, %309 : vector<15x128xf32>
    %cst_125 = arith.constant dense<0.000000e+00> : vector<15x2xf32>
    %311 = tpu.matmul %310, %8, %cst_125 {dimension_numbers = #tpu.dot_dimension_numbers<[1], [0], [0], [1], [0, 0, 1, 1], [], []>} : vector<15x128xf32>, vector<128x2xf32>, vector<15x2xf32> -> vector<15x2xf32>
    %312 = vector.broadcast %9 : vector<1x2xf32> to vector<15x2xf32>
    %313 = arith.addf %311, %312 : vector<15x2xf32>
    %cst_126 = arith.constant dense<0xFF800000> : vector<15xf32>
    %314 = vector.multi_reduction <maximumf>, %313, %cst_126 [1] : vector<15x2xf32> to vector<15xf32>
    %315 = vector.shape_cast %314 : vector<15xf32> to vector<15x1xf32>
    %316 = vector.broadcast %315 : vector<15x1xf32> to vector<15x2xf32>
    %317 = arith.subf %313, %316 : vector<15x2xf32>
    %318 = math.exp %317 : vector<15x2xf32>
    %cst_127 = arith.constant dense<0.000000e+00> : vector<15xf32>
    %319 = vector.multi_reduction <add>, %318, %cst_127 [1] : vector<15x2xf32> to vector<15xf32>
    %320 = vector.shape_cast %319 : vector<15xf32> to vector<15x1xf32>
    %321 = vector.broadcast %320 : vector<15x1xf32> to vector<15x2xf32>
    %322 = arith.divf %318, %321 : vector<15x2xf32>
    %cst_128 = arith.constant dense<0.000000e+00> : vector<2x15xf32>
    %323 = tpu.matmul %322, %302, %cst_128 {dimension_numbers = #tpu.dot_dimension_numbers<[0], [0], [1], [1], [0, 1, 1, 1], [], []>} : vector<15x2xf32>, vector<15x15xf32>, vector<2x15xf32> -> vector<2x15xf32>
    %cst_129 = arith.constant dense<0.000000e+00> : vector<2x2xf32>
    %324 = tpu.matmul %323, %322, %cst_129 {dimension_numbers = #tpu.dot_dimension_numbers<[1], [0], [0], [1], [0, 0, 1, 1], [], []>} : vector<2x15xf32>, vector<15x2xf32>, vector<2x2xf32> -> vector<2x2xf32>
    %325 = tpu.iota {dimensions = array<i32: 0>} : vector<2x2xi32>
    %326 = tpu.iota {dimensions = array<i32: 1>} : vector<2x2xi32>
    %327 = arith.cmpi eq, %325, %326 : vector<2x2xi32>
    %328 = arith.extui %327 : vector<2x2xi1> to vector<2x2xi32>
    %329 = arith.sitofp %328 : vector<2x2xi32> to vector<2x2xf32>
    %330 = arith.mulf %324, %329 : vector<2x2xf32>
    %331 = vector.shape_cast %330 : vector<2x2xf32> to vector<1x2x2xf32>
    %cst_130 = arith.constant dense<0.000000e+00> : vector<1xf32>
    %332 = vector.multi_reduction <add>, %331, %cst_130 [1, 2] : vector<1x2x2xf32> to vector<1xf32>
    %333 = vector.shape_cast %332 : vector<1xf32> to vector<1x1x1xf32>
    %334 = vector.extract %333[0, 0, 0] : f32 from vector<1x1x1xf32>
    %cst_131 = arith.constant dense<0.000000e+00> : vector<15xf32>
    %335 = vector.multi_reduction <add>, %302, %cst_131 [1] : vector<15x15xf32> to vector<15xf32>
    %336 = vector.shape_cast %335 : vector<15xf32> to vector<15x1xf32>
    %337 = arith.mulf %322, %322 : vector<15x2xf32>
    %cst_132 = arith.constant dense<0.000000e+00> : vector<15xf32>
    %338 = vector.multi_reduction <add>, %337, %cst_132 [1] : vector<15x2xf32> to vector<15xf32>
    %339 = vector.shape_cast %338 : vector<15xf32> to vector<15x1xf32>
    %340 = arith.mulf %336, %339 : vector<15x1xf32>
    %341 = vector.shape_cast %340 : vector<15x1xf32> to vector<1x15x1xf32>
    %cst_133 = arith.constant dense<0.000000e+00> : vector<1xf32>
    %342 = vector.multi_reduction <add>, %341, %cst_133 [1, 2] : vector<1x15x1xf32> to vector<1xf32>
    %343 = vector.shape_cast %342 : vector<1xf32> to vector<1x1x1xf32>
    %344 = vector.extract %343[0, 0, 0] : f32 from vector<1x1x1xf32>
    %345 = arith.divf %334, %344 : f32
    %cst_134 = arith.constant 0.000000e+00 : f32
    %346 = arith.subf %cst_134, %345 : f32
    %cst_135 = arith.constant dense<0.000000e+00> : vector<2x2xf32>
    %347 = tpu.matmul %322, %322, %cst_135 {dimension_numbers = #tpu.dot_dimension_numbers<[0], [0], [1], [1], [0, 1, 1, 1], [], []>} : vector<15x2xf32>, vector<15x2xf32>, vector<2x2xf32> -> vector<2x2xf32>
    %348 = arith.mulf %347, %347 : vector<2x2xf32>
    %349 = vector.shape_cast %348 : vector<2x2xf32> to vector<1x2x2xf32>
    %cst_136 = arith.constant dense<0.000000e+00> : vector<1xf32>
    %350 = vector.multi_reduction <add>, %349, %cst_136 [1, 2] : vector<1x2x2xf32> to vector<1xf32>
    %351 = vector.shape_cast %350 : vector<1xf32> to vector<1x1x1xf32>
    %352 = vector.extract %351[0, 0, 0] : f32 from vector<1x1x1xf32>
    %353 = math.sqrt %352 : f32
    %354 = vector.broadcast %353 : f32 to vector<2x2xf32>
    %355 = arith.divf %347, %354 : vector<2x2xf32>
    %cst_137 = arith.constant 0.707106769 : f32
    %356 = vector.broadcast %cst_137 : f32 to vector<2x2xf32>
    %357 = arith.mulf %329, %356 : vector<2x2xf32>
    %358 = arith.subf %355, %357 : vector<2x2xf32>
    %359 = arith.mulf %358, %358 : vector<2x2xf32>
    %360 = vector.shape_cast %359 : vector<2x2xf32> to vector<1x2x2xf32>
    %cst_138 = arith.constant dense<0.000000e+00> : vector<1xf32>
    %361 = vector.multi_reduction <add>, %360, %cst_138 [1, 2] : vector<1x2x2xf32> to vector<1xf32>
    %362 = vector.shape_cast %361 : vector<1xf32> to vector<1x1x1xf32>
    %363 = vector.extract %362[0, 0, 0] : f32 from vector<1x1x1xf32>
    %364 = math.sqrt %363 : f32
    %cst_139 = arith.constant 1.000000e+00 : f32
    %365 = vector.broadcast %cst_139 : f32 to vector<2x2xf32>
    %366 = arith.subf %365, %329 : vector<2x2xf32>
    %367 = arith.mulf %324, %366 : vector<2x2xf32>
    %cst_140 = arith.constant dense<0.000000e+00> : vector<2xf32>
    %368 = vector.multi_reduction <add>, %367, %cst_140 [1] : vector<2x2xf32> to vector<2xf32>
    %369 = vector.shape_cast %368 : vector<2xf32> to vector<2x1xf32>
    %370 = math.sqrt %369 : vector<2x1xf32>
    %cst_141 = arith.constant 1.000000e-15 : f32
    %371 = vector.broadcast %cst_141 : f32 to vector<2x1xf32>
    %372 = arith.addf %370, %371 : vector<2x1xf32>
    %373 = tpu.transpose %372, [1, 0] : vector<2x1xf32> -> vector<1x2xf32>
    %374 = vector.broadcast %373 : vector<1x2xf32> to vector<2x2xf32>
    %375 = arith.divf %367, %374 : vector<2x2xf32>
    %376 = vector.broadcast %372 : vector<2x1xf32> to vector<2x2xf32>
    %377 = arith.divf %375, %376 : vector<2x2xf32>
    %cst_142 = arith.constant dense<0xFF800000> : vector<15xf32>
    %378 = vector.multi_reduction <maximumf>, %242, %cst_142 [1] : vector<15x128xf32> to vector<15xf32>
    %379 = vector.shape_cast %378 : vector<15xf32> to vector<15x1xf32>
    %380 = vector.broadcast %379 : vector<15x1xf32> to vector<15x128xf32>
    %381 = arith.subf %242, %380 : vector<15x128xf32>
    %382 = math.exp %381 : vector<15x128xf32>
    %cst_143 = arith.constant dense<0.000000e+00> : vector<15xf32>
    %383 = vector.multi_reduction <add>, %382, %cst_143 [1] : vector<15x128xf32> to vector<15xf32>
    %384 = vector.shape_cast %383 : vector<15xf32> to vector<15x1xf32>
    %385 = math.log %384 : vector<15x1xf32>
    %386 = vector.broadcast %385 : vector<15x1xf32> to vector<15x128xf32>
    %387 = arith.subf %381, %386 : vector<15x128xf32>
    %c1_144 = arith.constant 1 : index
    %c0_145 = arith.constant 0 : index
    %c0_146 = arith.constant 0 : index
    %388 = vector.load %arg13[%c1_144, %c0_145, %c0_146] : memref<2x15x128xf32, #tpu.memory_space<vmem>>, vector<1x15x128xf32>
    %389 = vector.shape_cast %388 : vector<1x15x128xf32> to vector<15x128xf32>
    %390 = vector.shape_cast %387 : vector<15x128xf32> to vector<1x15x128xf32>
    tpu.vector_store %arg13[%c1_144, %c0_145, %c0_146], %390 {strides = array<i32>} : memref<2x15x128xf32, #tpu.memory_space<vmem>>, vector<1x15x128xf32>,
    %c1_147 = arith.constant 1 : index
    %c0_148 = arith.constant 0 : index
    %c0_149 = arith.constant 0 : index
    %391 = vector.load %arg14[%c1_147, %c0_148, %c0_149] : memref<2x16x15xf32, #tpu.memory_space<vmem>>, vector<1x16x15xf32>
    %392 = vector.shape_cast %391 : vector<1x16x15xf32> to vector<16x15xf32>
    %393 = vector.shape_cast %232 : vector<16x15xf32> to vector<1x16x15xf32>
    tpu.vector_store %arg14[%c1_147, %c0_148, %c0_149], %393 {strides = array<i32>} : memref<2x16x15xf32, #tpu.memory_space<vmem>>, vector<1x16x15xf32>,
    %cst_150 = arith.constant 0.000000e+00 : f32
    %394 = vector.broadcast %cst_150 : f32 to vector<48x128xf32>
    %c1_151 = arith.constant 1 : index
    %c0_152 = arith.constant 0 : index
    %c0_153 = arith.constant 0 : index
    %395 = vector.load %arg15[%c1_151, %c0_152, %c0_153] : memref<2x48x128xf32, #tpu.memory_space<vmem>>, vector<1x48x128xf32>
    %396 = vector.shape_cast %395 : vector<1x48x128xf32> to vector<48x128xf32>
    %397 = vector.shape_cast %394 : vector<48x128xf32> to vector<1x48x128xf32>
    tpu.vector_store %arg15[%c1_151, %c0_152, %c0_153], %397 {strides = array<i32>} : memref<2x48x128xf32, #tpu.memory_space<vmem>>, vector<1x48x128xf32>,
    %c1_154 = arith.constant 1 : index
    %c0_155 = arith.constant 0 : index
    %c0_156 = arith.constant 0 : index
    %398 = vector.load %arg15[%c1_154, %c0_155, %c0_156] : memref<2x48x128xf32, #tpu.memory_space<vmem>>, vector<1x15x15xf32>
    %399 = vector.shape_cast %398 : vector<1x15x15xf32> to vector<15x15xf32>
    %400 = vector.shape_cast %302 : vector<15x15xf32> to vector<1x15x15xf32>
    tpu.vector_store %arg15[%c1_154, %c0_155, %c0_156], %400 {strides = array<i32>} : memref<2x48x128xf32, #tpu.memory_space<vmem>>, vector<1x15x15xf32>,
    %c1_157 = arith.constant 1 : index
    %c16_158 = arith.constant 16 : index
    %c0_159 = arith.constant 0 : index
    %401 = vector.load %arg15[%c1_157, %c16_158, %c0_159] : memref<2x48x128xf32, #tpu.memory_space<vmem>>, vector<1x15x2xf32>
    %402 = vector.shape_cast %401 : vector<1x15x2xf32> to vector<15x2xf32>
    %403 = vector.shape_cast %313 : vector<15x2xf32> to vector<1x15x2xf32>
    tpu.vector_store %arg15[%c1_157, %c16_158, %c0_159], %403 {strides = array<i32>} : memref<2x48x128xf32, #tpu.memory_space<vmem>>, vector<1x15x2xf32>,
    %c1_160 = arith.constant 1 : index
    %c32_161 = arith.constant 32 : index
    %c0_162 = arith.constant 0 : index
    %404 = vector.load %arg15[%c1_160, %c32_161, %c0_162] : memref<2x48x128xf32, #tpu.memory_space<vmem>>, vector<1x2x2xf32>
    %405 = vector.shape_cast %404 : vector<1x2x2xf32> to vector<2x2xf32>
    %406 = vector.shape_cast %377 : vector<2x2xf32> to vector<1x2x2xf32>
    tpu.vector_store %arg15[%c1_160, %c32_161, %c0_162], %406 {strides = array<i32>} : memref<2x48x128xf32, #tpu.memory_space<vmem>>, vector<1x2x2xf32>,
    %407 = tpu.iota {dimensions = array<i32: 1>} : vector<1x4xi32>
    %c0_i32_163 = arith.constant 0 : i32
    %408 = vector.broadcast %c0_i32_163 : i32 to vector<1x4xi32>
    %409 = arith.cmpi eq, %407, %408 : vector<1x4xi32>
    %c1_i32_164 = arith.constant 1 : i32
    %410 = vector.broadcast %c1_i32_164 : i32 to vector<1x4xi32>
    %411 = arith.cmpi eq, %407, %410 : vector<1x4xi32>
    %c2_i32_165 = arith.constant 2 : i32
    %412 = vector.broadcast %c2_i32_165 : i32 to vector<1x4xi32>
    %413 = arith.cmpi eq, %407, %412 : vector<1x4xi32>
    %414 = vector.broadcast %346 : f32 to vector<1x4xf32>
    %415 = vector.broadcast %364 : f32 to vector<1x4xf32>
    %416 = arith.select %413, %414, %415 : vector<1x4xi1>, vector<1x4xf32>
    %417 = vector.broadcast %284 : f32 to vector<1x4xf32>
    %418 = arith.select %411, %417, %416 : vector<1x4xi1>, vector<1x4xf32>
    %419 = vector.broadcast %266 : f32 to vector<1x4xf32>
    %420 = arith.select %409, %419, %418 : vector<1x4xi1>, vector<1x4xf32>
    %c1_166 = arith.constant 1 : index
    %c40_167 = arith.constant 40 : index
    %c0_168 = arith.constant 0 : index
    %421 = vector.load %arg15[%c1_166, %c40_167, %c0_168] : memref<2x48x128xf32, #tpu.memory_space<vmem>>, vector<1x1x4xf32>
    %422 = vector.shape_cast %421 : vector<1x1x4xf32> to vector<1x4xf32>
    %423 = vector.shape_cast %420 : vector<1x4xf32> to vector<1x1x4xf32>
    tpu.vector_store %arg15[%c1_166, %c40_167, %c0_168], %423 {strides = array<i32>} : memref<2x48x128xf32, #tpu.memory_space<vmem>>, vector<1x1x4xf32>,
    return
  }
  func.func @transform_0(%arg0: i32) -> (i32, i32, i32) {
    %c0_i32 = arith.constant 0 : i32
    %c0_i32_0 = arith.constant 0 : i32
    %c0_i32_1 = arith.constant 0 : i32
    return %arg0, %c0_i32, %c0_i32_0 : i32, i32, i32
  }
  func.func @transform_1(%arg0: i32) -> (i32, i32, i32) {
    %c0_i32 = arith.constant 0 : i32
    %c0_i32_0 = arith.constant 0 : i32
    %c0_i32_1 = arith.constant 0 : i32
    return %arg0, %c0_i32, %c0_i32_0 : i32, i32, i32
  }
  func.func @transform_2(%arg0: i32) -> (i32, i32) {
    %c0_i32 = arith.constant 0 : i32
    %c0_i32_0 = arith.constant 0 : i32
    %c0_i32_1 = arith.constant 0 : i32
    return %c0_i32, %c0_i32_0 : i32, i32
  }
  func.func @transform_3(%arg0: i32) -> (i32, i32) {
    %c0_i32 = arith.constant 0 : i32
    %c0_i32_0 = arith.constant 0 : i32
    %c0_i32_1 = arith.constant 0 : i32
    return %c0_i32, %c0_i32_0 : i32, i32
  }
  func.func @transform_4(%arg0: i32) -> (i32, i32) {
    %c0_i32 = arith.constant 0 : i32
    %c0_i32_0 = arith.constant 0 : i32
    %c0_i32_1 = arith.constant 0 : i32
    return %c0_i32, %c0_i32_0 : i32, i32
  }
  func.func @transform_5(%arg0: i32) -> (i32, i32) {
    %c0_i32 = arith.constant 0 : i32
    %c0_i32_0 = arith.constant 0 : i32
    %c0_i32_1 = arith.constant 0 : i32
    return %c0_i32, %c0_i32_0 : i32, i32
  }
  func.func @transform_6(%arg0: i32) -> (i32, i32) {
    %c0_i32 = arith.constant 0 : i32
    %c0_i32_0 = arith.constant 0 : i32
    %c0_i32_1 = arith.constant 0 : i32
    return %c0_i32, %c0_i32_0 : i32, i32
  }
  func.func @transform_7(%arg0: i32) -> (i32, i32) {
    %c0_i32 = arith.constant 0 : i32
    %c0_i32_0 = arith.constant 0 : i32
    %c0_i32_1 = arith.constant 0 : i32
    return %c0_i32, %c0_i32_0 : i32, i32
  }
  func.func @transform_8(%arg0: i32) -> (i32, i32) {
    %c0_i32 = arith.constant 0 : i32
    %c0_i32_0 = arith.constant 0 : i32
    %c0_i32_1 = arith.constant 0 : i32
    return %c0_i32, %c0_i32_0 : i32, i32
  }
  func.func @transform_9(%arg0: i32) -> (i32, i32) {
    %c0_i32 = arith.constant 0 : i32
    %c0_i32_0 = arith.constant 0 : i32
    %c0_i32_1 = arith.constant 0 : i32
    return %c0_i32, %c0_i32_0 : i32, i32
  }
  func.func @transform_10(%arg0: i32) -> (i32, i32) {
    %c0_i32 = arith.constant 0 : i32
    %c0_i32_0 = arith.constant 0 : i32
    %c0_i32_1 = arith.constant 0 : i32
    return %c0_i32, %c0_i32_0 : i32, i32
  }
  func.func @transform_11(%arg0: i32) -> (i32, i32) {
    %c0_i32 = arith.constant 0 : i32
    %c0_i32_0 = arith.constant 0 : i32
    %c0_i32_1 = arith.constant 0 : i32
    return %c0_i32, %c0_i32_0 : i32, i32
  }
  func.func @transform_12(%arg0: i32) -> (i32, i32, i32) {
    %c0_i32 = arith.constant 0 : i32
    %c0_i32_0 = arith.constant 0 : i32
    %c0_i32_1 = arith.constant 0 : i32
    return %arg0, %c0_i32, %c0_i32_0 : i32, i32, i32
  }
  func.func @transform_13(%arg0: i32) -> (i32, i32, i32) {
    %c0_i32 = arith.constant 0 : i32
    %c0_i32_0 = arith.constant 0 : i32
    %c0_i32_1 = arith.constant 0 : i32
    return %arg0, %c0_i32, %c0_i32_0 : i32, i32, i32
  }
  func.func @transform_14(%arg0: i32) -> (i32, i32, i32) {
    %c0_i32 = arith.constant 0 : i32
    %c0_i32_0 = arith.constant 0 : i32
    %c0_i32_1 = arith.constant 0 : i32
    return %arg0, %c0_i32, %c0_i32_0 : i32, i32, i32
  }
}

</mosaic_0001>

<bundles_post_ra>
// kernel: net_forward.1
= control target key start
LH: loop header
LB: loop body
LE: loop exit
PB: predicated region body
PF: predicated region fallthrough
CT: control target
= control target key end

     0   :  { %vm122_vm0 = vcmask 130048   ;;  %vm217_vm1 = vcmask 1043456   ;;  %vm210_vm2 = vcmask 31744   ;;  %vm465_vm3 = vcmask 121856   ;;  %s5881_s0 = inlined_call_operand.vmem [shape: f32[2,16,4], index: 0, kind: input, shape index: {}]   ;;  %s5882_s1 = inlined_call_operand.vmem [shape: s8[2,16,16], index: 1, kind: input, shape index: {}]   ;;  %s5883_s2 = inlined_call_operand.vmem [shape: f32[4,128], index: 2, kind: input, shape index: {}]   ;;  %s5884_s4 = inlined_call_operand.vmem [shape: f32[4,128], index: 4, kind: input, shape index: {}]   ;;  %s5885_s5 = inlined_call_operand.vmem [shape: f32[128,15], index: 5, kind: input, shape index: {}]   ;;  %s5886_s3 = inlined_call_operand.vmem [shape: f32[1,128], index: 3, kind: input, shape index: {}]   ;;  %s5887_s6 = inlined_call_operand.vmem [shape: f32[1,15], index: 6, kind: input, shape index: {}]   ;;  %s5888_s13 = inlined_call_operand.vmem [shape: f32[2,16,15], index: 13, kind: output, shape index: {1}]   ;;  %s5889_s14 = inlined_call_operand.vmem [shape: f32[2,48,128], index: 14, kind: output, shape index: {2}]   ;;  %s5890_s7 = inlined_call_operand.vmem [shape: f32[128,128], index: 7, kind: input, shape index: {}]   ;;  %s5891_s9 = inlined_call_operand.vmem [shape: f32[128,128], index: 9, kind: input, shape index: {}]   ;;  %s5892_s10 = inlined_call_operand.vmem [shape: f32[128,2], index: 10, kind: input, shape index: {}]   ;;  %s5893_s8 = inlined_call_operand.vmem [shape: f32[1,128], index: 8, kind: input, shape index: {}]   ;;  %s5894_s11 = inlined_call_operand.vmem [shape: f32[1,2], index: 11, kind: input, shape index: {}]   ;;  %s5895_s12 = inlined_call_operand.vmem [shape: f32[2,15,128], index: 12, kind: output, shape index: {0}]  }
   0x1   :  { %v114_v0 = vld [vmem:[%s5881_s0] sm:$0xff]  ;;  %v115_v1 = vld [vmem:[%s5881_s0 + $0x8] sm:$0xff]  ;;  %v49_v12 = vld [vmem:[%s5885_s5 + $0x10] sm:$0xff]  ;;  %vm1025_vm4 = vcmask 1046528   ;;  %vm4727_vm5 = vmmov 1   ;;  %vm771_vm9 = vcmask 120832  }
   0x2   :  { %v4816_v2 = vld [vmem:[%s5882_s1] sm:$0xf]   ;;  %v4204_v3 = vpack.c.bf16 %v115_v1, %v114_v0  ;;  %v48_v11 = vld [vmem:[%s5885_s5 + $0x8] sm:$0xff]  ;;  %v50_v14 = vld [vmem:[%s5885_s5 + $0x18] sm:$0xff] }
   0x3   :  { %v3550_v4 = vunpack.c.0.s8 %v4816_v2  ;;  %v3551_v5 = vunpack.c.1.s8 %v4816_v2  ;;  %v4823_v6 = vld [vmem:[%s5883_s2] sm:$0xf]  ;;  %v4858_v15 = vpack.c.bf16 %v50_v14, %v49_v12  ;;  %v52_v17 = vld [vmem:[%s5885_s5 + $0x28] sm:$0xff]  ;;  %v53_v19 = vld [vmem:[%s5885_s5 + $0x30] sm:$0xff] }
   0x4   :  { %4205 = vmatprep.subr.bf16.mxu1 %v4204_v3  ;;  %v4840_v9 = vld [vmem:[%s5884_s4] sm:$0xf]  ;;  %v54_v20 = vld [vmem:[%s5885_s5 + $0x38] sm:$0xff]  ;;  %v56_v23 = vld [vmem:[%s5885_s5 + $0x48] sm:$0xff] }
   0x5   :  { %v4825_v7 = vcvt.s32.f32 %v3550_v4  ;;  %v4827_v8 = vcvt.s32.f32 %v3551_v5  ;;  %4207 = vmatpush3.bf16.msra.mxu1 %v4204_v3  ;;  %v47_v10 = vld [vmem:[%s5885_s5] sm:$0xff]  ;;  %v4879_v21 = vpack.c.bf16 %v54_v20, %v53_v19  ;;  %v57_v25 = vld [vmem:[%s5885_s5 + $0x50] sm:$0xff]  ;;  %v58_v26 = vld [vmem:[%s5885_s5 + $0x58] sm:$0xff]  ;;  %v4244_v3 = vunpack.c.l.s8.bf16 %v4816_v2 }
   0x6   :  { %3785 = vmatprep.subr.msk.mxu1 %vm217_vm1, %v4823_v6  ;;  %v4853_v13 = vpack.c.bf16 %v48_v11, %v47_v10  ;;  %v51_v16 = vld [vmem:[%s5885_s5 + $0x20] sm:$0xff]  ;;  %v4899_v27 = vpack.c.bf16 %v58_v26, %v57_v25  ;;  %v60_v29 = vld [vmem:[%s5885_s5 + $0x68] sm:$0xff]  ;;  %v61_v33 = vld [vmem:[%s5885_s5 + $0x70] sm:$0xff]  ;;  %v757_v20 = vlaneseq  ;;  %v5898_v26 = vmov 0.0  }
   0x7   :  { %3782 = vmatprep.mubr.msk.f32.mxu1 %vm122_vm0, %v4825_v7  ;;  %v4869_v18 = vpack.c.bf16 %v52_v17, %v51_v16  ;;  %v55_v22 = vld [vmem:[%s5885_s5 + $0x40] sm:$0xff]  ;;  %v62_v34 = vld [vmem:[%s5885_s5 + $0x78] sm:$0xff]  ;;  %vm4977_vm6 = vmpackc.low %vm1025_vm4, %vm4727_vm5  ;;  %1791 = vst [vmem:[%s5889_s14] sm:$0xff] %v5898_v26 }
   0x8   :  { %3783 = vmatmul.mubr.msk.f32.vlgmr.msra.gmra.mrb[0].mxu1 %vm122_vm0, %v4827_v8  ;;  %4209 = vmatprep.subr.bf16.mxu0 %v4853_v13  ;;  %v4889_v24 = vpack.c.bf16 %v56_v23, %v55_v22  ;;  %v59_v28 = vld [vmem:[%s5885_s5 + $0x60] sm:$0xff]  ;;  %v4926_v35 = vpack.c.bf16 %v62_v34, %v61_v33  ;;  %v4988_v22 = vshrl.u32 %v757_v20, 7  ;;  %v4990_v23 = vand.u32 127, %v757_v20  ;;  %1792 = vst [vmem:[%s5889_s14 + $0x8] sm:$0xff] %v5898_v26 }
   0x9   :  { %3786 = vmatpush3.msk.msra.mxu1 %vm217_vm1, %v4823_v6  ;;  %4211 = vmatpush3.bf16.msra.mxu0 %v4853_v13  ;;  %v4909_v30 = vpack.c.bf16 %v60_v29, %v59_v28  ;;  %v4933_v36 = vld [vmem:[%s5886_s3] ss:$0 sm:$0xff]  ;;  %1793 = vst [vmem:[%s5889_s14 + $0x10] sm:$0xff] %v5898_v26  ;;  %1794 = vst [vmem:[%s5889_s14 + $0x18] sm:$0xff] %v5898_v26 }
   0xa   :  { %3790 = vmatprep.subr.msk.mxu1 %vm217_vm1, %v4840_v9  ;;  %4213 = vmatprep.subr.bf16.mxu0 %v4858_v15  ;;  %v4940_v44 = vld [vmem:[%s5887_s6] ss:$0 sm:$0xff]  ;;  %5916 = vst [vmem:[#allocation4_spill] sm:$0xff] %v4990_v23  ;;  %v759_v25 = vadd.s32 8, %v4988_v22  ;;  %vm762_vm7 = vcmp.eq.s32.totalorder %v4988_v22, %v4990_v23  ;;  %1795 = vst [vmem:[%s5889_s14 + $0x20] sm:$0xff] %v5898_v26 }
   0xb   :  { %v4997_v28 = vsel %vm762_vm7, 1.0, %v5898_v26  ;;  %1796 = vst [vmem:[%s5889_s14 + $0x28] sm:$0xff] %v5898_v26  ;;  %3536 = vst [vmem:[%s5889_s14 + $0x30] sm:$0xff] %v5898_v26  ;;  %vm1349_vm7 = vcmask 14336  }
   0xc   :  { %vm763_vm8 = vcmp.eq.s32.totalorder %v759_v25, %v4990_v23  ;;  %3537 = vst [vmem:[%s5889_s14 + $0x38] sm:$0xff] %v5898_v26  ;;  %3538 = vst [vmem:[%s5889_s14 + $0x40] sm:$0xff] %v5898_v26 }
   0xd   :  { %4215 = vmatpush3.bf16.msra.mxu0 %v4858_v15  ;;  %v5000_v29 = vsel %vm763_vm8, 1.0, %v5898_v26  ;;  %3539 = vst [vmem:[%s5889_s14 + $0x48] sm:$0xff] %v5898_v26  ;;  %3540 = vst [vmem:[%s5889_s14 + $0x50] sm:$0xff] %v5898_v26  ;;  %vm1345_vm8 = vcmask 15360  }
   0xe   :  { %4217 = vmatprep.subr.bf16.mxu0 %v4869_v18  ;;  %v5897_v33 = vsub.f32 1.0, %v5000_v29  ;;  %3541 = vst [vmem:[%s5889_s14 + $0x58] sm:$0xff] %v5898_v26 }
  0x11   :  { %4219 = vmatpush3.bf16.msra.mxu0 %v4869_v18 }
  0x12   :  { %4221 = vmatprep.subr.bf16.mxu0 %v4879_v21 }
  0x15   :  { %4223 = vmatpush3.bf16.msra.mxu0 %v4879_v21 }
  0x16   :  { %4225 = vmatprep.subr.bf16.mxu0 %v4889_v24 }
  0x19   :  { %4227 = vmatpush3.bf16.msra.mxu0 %v4889_v24 }
  0x1a   :  { %4229 = vmatprep.subr.bf16.mxu0 %v4899_v27 }
  0x1d   :  { %4231 = vmatpush3.bf16.msra.mxu0 %v4899_v27 }
  0x1e   :  { %4233 = vmatprep.subr.bf16.mxu0 %v4909_v30 }
  0x21   :  { %4235 = vmatpush3.bf16.msra.mxu0 %v4909_v30 }
  0x22   :  { %4237 = vmatprep.subr.bf16.mxu0 %v4926_v35 }
  0x25   :  { %4239 = vmatpush3.bf16.msra.mxu0 %v4926_v35 }
  0xdb   :  { %v3784_v31 = vpop.f32.mrb[0].mxu1 }
  0xdc   :  { %v195_v32 = vpop.f32.mrb[1].mxu1 }
  0xdd   :  { %3787 = vmatprep.mubr.msk.f32.mxu1 %vm210_vm2, %v195_v32 }
  0xde   :  { %3788 = vmatmul.mubr.msk.f32.vlgmr.msra.gmra.mrb[2].mxu1 %vm210_vm2, %v3784_v31  ;;  %v5003_v31 = vsub.f32 1.0, %v4997_v28 }
  0xdf   :  { %3791 = vmatpush3.msk.msra.mxu1 %vm217_vm1, %v4840_v9  ;;  %3792 = vmatprep.mubr.msk.f32.mxu1 %vm210_vm2, %v114_v0 }
  0xe0   :  { %5917 = vst [vmem:[#allocation5_spill] sm:$0xff] %v5003_v31 }
  0xe6   :  { %3793 = vmatmul.mubr.msk.f32.vlgmr.msra.gmra.mrb[2].mxu1 %vm210_vm2, %v115_v1 }
 0x1b9   :  { %v3794_v37 = vpop.f32.mrb[2].mxu1 }
 0x1ba   :  { %v4536_v38 = vadd.f32 %v3794_v37, %v4933_v36  ;;  %v371_v39 = vpop.f32.mrb[3].mxu1 }
 0x1bb   :  { %v4537_v40 = vadd.f32 %v4933_v36, %v371_v39 }
 0x1bc   :  { %v383_v41 = vmax.f32 %v4536_v38, 0.0 }
 0x1bd   :  { %v382_v42 = vmax.f32 %v4537_v40, 0.0 }
 0x1bf   :  { %v4240_v43 = vpack.c.bf16 %v383_v41, %v382_v42  ;;  %3827 = vmatprep.mubr.f32.mxu0 %v382_v42 }
 0x1c0   :  { %3828 = vmatmul.mubr.f32.vlgmr.msra.gmra.mrb[0].mxu0 %v383_v41 }
 0x1c1   :  { %4241 = vmatprep.subr.bf16.mxu1 %v4240_v43 }
 0x1c2   :  { %4243 = vmatpush3.bf16.msra.mxu1 %v4240_v43 }
 0x1c3   :  { %4245 = vmatprep.subr.bf16.mxu1 %v4244_v3 }
 0x293   :  { %v3829_v45 = vpop.f32.mrb[0].mxu0 }
 0x294   :  { %v462_v46 = vadd.f32 %v3829_v45, %v4940_v44  ;;  %v456_v47 = vpop.f32.mrb[1].mxu0 }
 0x295   :  { %v457_v48 = vadd.f32 %v4940_v44, %v456_v47 }
 0x296   :  { %1790 = vst.msk [vmem:[%s5888_s13 + $0x8] sm:$0xff] %vm465_vm3, %v462_v46  ;;  %v469_v50 = vsel %vm465_vm3, %v462_v46, -inf }
 0x297   :  { %1789 = vst.msk [vmem:[%s5888_s13] sm:$0xff] %vm465_vm3, %v457_v48  ;;  %v466_v49 = vsel %vm465_vm3, %v457_v48, -inf }
 0x298   :  { %467 = vmax.xlane.f32.xlu0 %v466_v49 }
 0x29c   :  { %470 = vmax.xlane.f32.xlu0 %v469_v50 }
 0x325   :  { %v468_v51 = vpop.xlane.xlu0 %467 }
 0x326   :  { %v472_v52 = vsub.f32 %v457_v48, %v468_v51 }
 0x328   :  { %v474_v53 = vmul.f32 1.442695, %v472_v52 }
 0x329   :  { %v471_v54 = vpop.xlane.xlu0 %470 }
 0x32a   :  { %4614 = vpow2.f32 %v474_v53  ;;  %v473_v55 = vsub.f32 %v462_v46, %v471_v54 }
 0x32c   :  { %v476_v56 = vmul.f32 1.442695, %v473_v55 }
 0x32e   :  { %4616 = vpow2.f32 %v476_v56 }
 0x334   :  { %v4615_v57 = vpop.eup %4614 }
 0x335   :  { %v478_v58 = vsel %vm465_vm3, %v4615_v57, 0.0 }
 0x336   :  { %479 = vadd.xlane.f32.xlu1 %v478_v58 }
 0x338   :  { %v4617_v59 = vpop.eup %4616 }
 0x339   :  { %v481_v60 = vsel %vm465_vm3, %v4617_v59, 0.0 }
 0x33a   :  { %482 = vadd.xlane.f32.xlu1 %v481_v60 }
 0x3c3   :  { %v480_v61 = vpop.xlane.xlu1 %479 }
 0x3c4   :  { %4618 = vrcp.f32 %v480_v61 }
 0x3c7   :  { %v483_v62 = vpop.xlane.xlu1 %482 }
 0x3c8   :  { %4620 = vrcp.f32 %v483_v62 }
 0x3ce   :  { %v4619_v63 = vpop.eup %4618 }
 0x3cf   :  { %v4956_v0 = vmul.f32 %v4619_v63, %v4615_v57 }
 0x3d1   :  { %488 = vxpose.xlu0.b32.start [1/2] (short) (narrow) %v4956_v0, 16 }
 0x3d2   :  { %v4621_v1 = vpop.eup %4620 }
 0x3d3   :  { %v4960_v4 = vmul.f32 %v4621_v1, %v4617_v59 }
 0x3d5   :  { %489 = vxpose.xlu0.b32.end [2/2] (short) (narrow) %v4960_v4, 16  ;;  %v4248_v5 = vpack.c.bf16 %v4960_v4, %v4956_v0 }
 0x451   :  { %v504_v10 = vpop.trf.xlu0 }
 0x452   :  { %3834 = vmatprep.mubr.msk.f32.mxu1 %vm122_vm0, %v504_v10 }
 0x455   :  { %v505_v11 = vpop.trf.xlu0 }
 0x456   :  { %3835 = vmatmul.mubr.msk.f32.vlgmr.msra.gmra.mrb[4].mxu1 %vm122_vm0, %v505_v11 }
 0x457   :  { %4247 = vmatpush3.bf16.msra.mxu1 %v4244_v3  ;;  %3841 = vmatprep.mubr.msk.f32.mxu1 %vm122_vm0, %v504_v10 }
 0x458   :  { %4249 = vmatprep.subr.bf16.mxu1 %v4248_v5 }
 0x45a   :  { %3842 = vmatmul.mubr.msk.f32.vlgmr.msra.gmra.mrb[6].mxu1 %vm122_vm0, %v505_v11 }
 0x45b   :  { %4251 = vmatpush3.bf16.msra.mxu1 %v4248_v5 }
 0x45c   :  { %4253 = vmatprep.subr.bf16.mxu1 %v4248_v5 }
 0x529   :  { %v4969_v2 = vpop.f32.mrb[4].mxu1 }
 0x52a   :  { %5912 = vst [vmem:[#allocation2_spill] sm:$0xff] %v4969_v2  ;;  %v4971_v12 = vpop.f32.mrb[5].mxu1 }
 0x52b   :  { %5913 = vst [vmem:[#allocation3_spill] sm:$0xff] %v4971_v12  ;;  %v4256_v14 = vpack.c.bf16 %v4969_v2, %v4971_v12 }
 0x52d   :  { %v3843_v16 = vpop.f32.mrb[6].mxu1 }
 0x52e   :  { %v667_v17 = vpop.f32.mrb[7].mxu1 }
 0x52f   :  { %3848 = vmatprep.mubr.msk.f32.mxu1 %vm122_vm0, %v667_v17  ;;  %v5093_v17 = vsub.s32 0, %v4988_v22  ;;  %v66_v22 = vld [vmem:[%s5890_s7 + $0x10] sm:$0xff] }
 0x530   :  { %3849 = vmatmul.mubr.msk.f32.vlgmr.msra.gmra.mrb[8].mxu1 %vm122_vm0, %v3843_v16 }
 0x531   :  { %4255 = vmatpush3.bf16.msra.mxu1 %v4248_v5  ;;  %3855 = vmatprep.mubr.msk.f32.mxu1 %vm122_vm0, %v504_v10 }
 0x532   :  { %4258 = vmatprep.subr.msk.bf16.mxu1 %vm4977_vm6, %v4256_v14 }
 0x534   :  { %3856 = vmatmul.mubr.msk.f32.vlgmr.msra.gmra.mrb[10].mxu1 %vm122_vm0, %v505_v11  ;;  %v64_v11 = vld [vmem:[%s5890_s7] sm:$0xff] }
 0x535   :  { %4261 = vmatpush3.bf16.msk.msra.mxu1 %vm4977_vm6, %v4256_v14  ;;  %v65_v14 = vld [vmem:[%s5890_s7 + $0x8] sm:$0xff] }
 0x536   :  { %v5089_v16 = vpack.c.bf16 %v65_v14, %v64_v11  ;;  %v81_v14 = vld [vmem:[%s5891_s9] sm:$0xff] }
 0x538   :  { %4263 = vmatprep.subr.bf16.mxu1 %v5089_v16 }
 0x603   :  { %v3850_v32 = vpop.f32.mrb[8].mxu1 }
 0x604   :  { %v769_v34 = vmul.f32 %v3850_v32, %v5000_v29  ;;  %v748_v37 = vpop.f32.mrb[9].mxu1  ;;  %v5014_v41 = vmul.f32 %v3850_v32, %v5897_v33 }
 0x605   :  { %v768_v38 = vmul.f32 %v4997_v28, %v748_v37  ;;  %v5009_v39 = vmul.f32 %v5003_v31, %v748_v37 }
 0x606   :  { %v772_v40 = vsel %vm771_vm9, %v769_v34, 0.0  ;;  %v953_v51 = vsel %vm771_vm9, %v5014_v41, 0.0 }
 0x607   :  { %v5016_v42 = vpop.f32.mrb[10].mxu1  ;;  %v950_v43 = vsel %vm465_vm3, %v5009_v39, 0.0  ;;  %v770_v45 = vsel %vm465_vm3, %v768_v38, 0.0 }
 0x608   :  { %v893_v46 = vmul.f32 %v5016_v42, %v5016_v42  ;;  %951 = vadd.xlane.f32.xlu1 %v950_v43  ;;  %v5023_v47 = vpop.f32.mrb[11].mxu1  ;;  %v5025_v48 = vadd.f32 %v772_v40, %v770_v45 }
 0x609   :  { %v892_v49 = vmul.f32 %v5023_v47, %v5023_v47 }
 0x60a   :  { %v895_v50 = vsel %vm771_vm9, %v893_v46, 0.0  ;;  %v67_v46 = vld [vmem:[%s5890_s7 + $0x18] sm:$0xff] }
 0x60b   :  { %v894_v52 = vsel %vm465_vm3, %v892_v49, 0.0  ;;  %v5115_v49 = vpack.c.bf16 %v67_v46, %v66_v22  ;;  %v101_v22 = vld [vmem:[%s5892_s10 + $0x20] sm:$0xff]  ;;  %v102_v46 = vld [vmem:[%s5892_s10 + $0x28] sm:$0xff] }
 0x60c   :  { %954 = vadd.xlane.f32.xlu1 %v953_v51  ;;  %v5033_v53 = vadd.f32 %v895_v50, %v894_v52  ;;  %v68_v50 = vld [vmem:[%s5890_s7 + $0x20] sm:$0xff]  ;;  %v69_v51 = vld [vmem:[%s5890_s7 + $0x28] sm:$0xff] }
 0x60d   :  { %v5139_v52 = vpack.c.bf16 %v69_v51, %v68_v50  ;;  %v5228_v50 = vpack.c.bf16 %v102_v46, %v101_v22  ;;  %v103_v51 = vld [vmem:[%s5892_s10 + $0x30] sm:$0xff]  ;;  %v85_v22 = vld [vmem:[%s5891_s9 + $0x20] sm:$0xff]  ;;  %v86_v46 = vld [vmem:[%s5891_s9 + $0x28] sm:$0xff] }
 0x695   :  { %v952_v54 = vpop.xlane.xlu1 %951 }
 0x696   :  { %4622 = vrsqrt.f32 %v952_v54  ;;  %vm958_vm10 = vcmp.eq.f32.partialorder %v952_v54, inf  ;;  %v961_v58 = vand.u32 2147483648, %v952_v54  ;;  %vm960_vm11 = vcmp.eq.f32.partialorder %v952_v54, 0.0 }
 0x699   :  { %v955_v55 = vpop.xlane.xlu1 %954 }
 0x69a   :  { %4624 = vrsqrt.f32 %v955_v55  ;;  %vm965_vm12 = vcmp.eq.f32.partialorder %v955_v55, inf  ;;  %v968_v1 = vand.u32 2147483648, %v955_v55  ;;  %vm967_vm13 = vcmp.eq.f32.partialorder %v955_v55, 0.0 }
 0x6a0   :  { %v4623_v56 = vpop.eup %4622 }
 0x6a1   :  { %v957_v57 = vmul.f32 %v4623_v56, %v952_v54 }
 0x6a3   :  { %v959_v59 = vsel %vm958_vm10, %v952_v54, %v957_v57  ;;  %v70_v54 = vld [vmem:[%s5890_s7 + $0x30] sm:$0xff]  ;;  %v72_v57 = vld [vmem:[%s5890_s7 + $0x40] sm:$0xff]  ;;  %vm4731_vm10 = vmmov 0  }
 0x6a4   :  { %v4625_v60 = vpop.eup %4624  ;;  %v962_v61 = vsel %vm960_vm11, %v961_v58, %v959_v59  ;;  %v73_v58 = vld [vmem:[%s5890_s7 + $0x48] sm:$0xff] }
 0x6a5   :  { %v970_v62 = vadd.f32 1e-15, %v962_v61  ;;  %v964_v63 = vmul.f32 %v4625_v60, %v955_v55  ;;  %v5159_v59 = vpack.c.bf16 %v73_v58, %v72_v57  ;;  %v74_v60 = vld [vmem:[%s5890_s7 + $0x50] sm:$0xff]  ;;  %v75_v61 = vld [vmem:[%s5890_s7 + $0x58] sm:$0xff]  ;;  %v105_v57 = vld [vmem:[%s5892_s10 + $0x40] sm:$0xff] }
 0x6a6   :  { %v106_v58 = vld [vmem:[%s5892_s10 + $0x48] sm:$0xff] }
 0x6a7   :  { %972 = vxpose.xlu1.b32.start [1/2] (short) (narrow) %v970_v62, 8  ;;  %v966_v3 = vsel %vm965_vm12, %v955_v55, %v964_v63  ;;  %v71_v55 = vld [vmem:[%s5890_s7 + $0x38] sm:$0xff]  ;;  %v76_v63 = vld [vmem:[%s5890_s7 + $0x60] sm:$0xff]  ;;  %vm799_vm12 = vcmask 7168  }
 0x6a8   :  { %v969_v5 = vsel %vm967_vm13, %v968_v1, %v966_v3  ;;  %v5149_v56 = vpack.c.bf16 %v71_v55, %v70_v54  ;;  %v77_v1 = vld [vmem:[%s5890_s7 + $0x68] sm:$0xff]  ;;  %v104_v54 = vld [vmem:[%s5892_s10 + $0x38] sm:$0xff] }
 0x6a9   :  { %v971_v10 = vadd.f32 1e-15, %v969_v5  ;;  %v5179_v3 = vpack.c.bf16 %v77_v1, %v76_v63  ;;  %v78_v5 = vld [vmem:[%s5890_s7 + $0x70] sm:$0xff]  ;;  %v5238_v55 = vpack.c.bf16 %v104_v54, %v103_v51  ;;  %v108_v63 = vld [vmem:[%s5892_s10 + $0x58] sm:$0xff]  ;;  %v5290_v51 = vpack.c.bf16 %v86_v46, %v85_v22 }
 0x6aa   :  { %v87_v54 = vld [vmem:[%s5891_s9 + $0x30] sm:$0xff] }
 0x6ab   :  { %973 = vxpose.xlu1.b32.end [2/2] (short) (narrow) %v971_v10, 8  ;;  %v95_v46 = vld [vmem:[%s5891_s9 + $0x70] sm:$0xff] }
 0x727   :  { %v988_v20 = vpop.trf.xlu1 }
 0x728   :  { %v1007_v25 = vrot.slane %v988_v20, %v5093_v17  ;;  %v82_v20 = vld [vmem:[%s5891_s9 + $0x8] sm:$0xff] }
 0x72a   :  { %4626 = vrcp.f32 %v1007_v25  ;;  %v5200_v25 = vpack.c.bf16 %v82_v20, %v81_v14  ;;  %v83_v20 = vld [vmem:[%s5891_s9 + $0x10] sm:$0xff] }
 0x72b   :  { %4628 = vrcp.f32 %v970_v62  ;;  %v5169_v62 = vpack.c.bf16 %v75_v61, %v74_v60  ;;  %v5248_v60 = vpack.c.bf16 %v106_v58, %v105_v57  ;;  %v107_v61 = vld [vmem:[%s5892_s10 + $0x50] sm:$0xff]  ;;  %v88_v57 = vld [vmem:[%s5891_s9 + $0x38] sm:$0xff] }
 0x72c   :  { %4630 = vrcp.f32 %v971_v10  ;;  %v79_v10 = vld [vmem:[%s5890_s7 + $0x78] sm:$0xff]  ;;  %v5258_v1 = vpack.c.bf16 %v108_v63, %v107_v61  ;;  %v5300_v58 = vpack.c.bf16 %v88_v57, %v87_v54  ;;  %v89_v61 = vld [vmem:[%s5891_s9 + $0x40] sm:$0xff]  ;;  %v90_v63 = vld [vmem:[%s5891_s9 + $0x48] sm:$0xff] }
 0x72d   :  { %v5189_v11 = vpack.c.bf16 %v79_v10, %v78_v5  ;;  %v109_v5 = vld [vmem:[%s5892_s10 + $0x60] sm:$0xff]  ;;  %v110_v10 = vld [vmem:[%s5892_s10 + $0x68] sm:$0xff]  ;;  %v96_v54 = vld [vmem:[%s5891_s9 + $0x78] sm:$0xff] }
 0x72e   :  { %v5268_v14 = vpack.c.bf16 %v110_v10, %v109_v5  ;;  %v5310_v5 = vpack.c.bf16 %v90_v63, %v89_v61  ;;  %v91_v10 = vld [vmem:[%s5891_s9 + $0x50] sm:$0xff]  ;;  %v5340_v57 = vpack.c.bf16 %v96_v54, %v95_v46 }
 0x734   :  { %v4627_v32 = vpop.eup %4626 }
 0x735   :  { %v4629_v34 = vpop.eup %4628  ;;  %v1009_v37 = vmul.f32 %v4627_v32, %v5009_v39  ;;  %v1010_v38 = vmul.f32 %v4627_v32, %v5014_v41  ;;  %v97_v32 = vld [vmem:[%s5892_s10] sm:$0xff] }
 0x736   :  { %v4631_v40 = vpop.eup %4630 }
 0x737   :  { %v5098_v43 = vmul.f32 %v4629_v34, %v1009_v37  ;;  %v1014_v45 = vmul.f32 %v4631_v40, %v1010_v38  ;;  %v98_v34 = vld [vmem:[%s5892_s10 + $0x8] sm:$0xff]  ;;  %v99_v37 = vld [vmem:[%s5892_s10 + $0x10] sm:$0xff]  ;;  %v100_v40 = vld [vmem:[%s5892_s10 + $0x18] sm:$0xff] }
 0x738   :  { %v5212_v38 = vpack.c.bf16 %v98_v34, %v97_v32  ;;  %v84_v32 = vld [vmem:[%s5891_s9 + $0x18] sm:$0xff] }
 0x739   :  { %vm1015_vm14 = vcmp.gt.f32.partialorder %v5098_v43, 0.2  ;;  %vm1016_vm15 = vcmp.gt.f32.partialorder %v1014_v45, 0.2  ;;  %v5217_v45 = vpack.c.bf16 %v100_v40, %v99_v37  ;;  %v5279_v40 = vpack.c.bf16 %v84_v32, %v83_v20  ;;  %v92_v20 = vld [vmem:[%s5891_s9 + $0x58] sm:$0xff] }
 0x73a   :  { %v5110_v39 = vsel %vm1015_vm14, 1.0, %v5898_v26  ;;  %v5113_v41 = vsel %vm1016_vm15, 1.0, %v5898_v26  ;;  %4327 = vmatprep.subr.bf16.mxu0 %v5212_v38  ;;  %v5320_v32 = vpack.c.bf16 %v92_v20, %v91_v10  ;;  %v5896_v20 = vmov 1.0   ;;  %vm4360_vm5 = vmpackc.low %vm1025_vm4, %vm1015_vm14 }
 0x73b   :  { %3862 = vmatprep.mubr.msk.f32.mxu1 %vm465_vm3, %v5110_v39  ;;  %1797 = vst.msk [vmem:[%s5889_s14] sm:$0xff] %vm465_vm3, %v5110_v39  ;;  %4329 = vmatpush3.bf16.msra.mxu0 %v5212_v38 }
 0x73c   :  { %1798 = vst.msk [vmem:[%s5889_s14 + $0x8] sm:$0x7f] %vm771_vm9, %v5113_v41  ;;  %3863 = vmatmul.mubr.msk.f32.vlgmr.msra.gmra.mrb[12].mxu1 %vm465_vm3, %v5113_v41  ;;  %4331 = vmatprep.subr.bf16.mxu0 %v5217_v45 }
 0x73d   :  { %4265 = vmatpush3.bf16.msra.mxu1 %v5089_v16 }
 0x73e   :  { %4267 = vmatprep.subr.bf16.mxu1 %v5115_v49 }
 0x73f   :  { %4333 = vmatpush3.bf16.msra.mxu0 %v5217_v45 }
 0x740   :  { %4335 = vmatprep.subr.bf16.mxu0 %v5228_v50 }
 0x741   :  { %4269 = vmatpush3.bf16.msra.mxu1 %v5115_v49 }
 0x742   :  { %4271 = vmatprep.subr.bf16.mxu1 %v5139_v52 }
 0x743   :  { %4337 = vmatpush3.bf16.msra.mxu0 %v5228_v50 }
 0x744   :  { %4339 = vmatprep.subr.bf16.mxu0 %v5238_v55 }
 0x745   :  { %4273 = vmatpush3.bf16.msra.mxu1 %v5139_v52 }
 0x746   :  { %4275 = vmatprep.subr.bf16.mxu1 %v5149_v56 }
 0x747   :  { %4341 = vmatpush3.bf16.msra.mxu0 %v5238_v55 }
 0x748   :  { %4343 = vmatprep.subr.bf16.mxu0 %v5248_v60 }
 0x749   :  { %4277 = vmatpush3.bf16.msra.mxu1 %v5149_v56 }
 0x74a   :  { %4279 = vmatprep.subr.bf16.mxu1 %v5159_v59 }
 0x74b   :  { %4345 = vmatpush3.bf16.msra.mxu0 %v5248_v60 }
 0x74c   :  { %4347 = vmatprep.subr.bf16.mxu0 %v5258_v1 }
 0x74d   :  { %4281 = vmatpush3.bf16.msra.mxu1 %v5159_v59 }
 0x74e   :  { %4283 = vmatprep.subr.bf16.mxu1 %v5169_v62 }
 0x74f   :  { %4349 = vmatpush3.bf16.msra.mxu0 %v5258_v1 }
 0x750   :  { %4351 = vmatprep.subr.bf16.mxu0 %v5268_v14 }
 0x751   :  { %4285 = vmatpush3.bf16.msra.mxu1 %v5169_v62 }
 0x752   :  { %4287 = vmatprep.subr.bf16.mxu1 %v5179_v3 }
 0x753   :  { %4353 = vmatpush3.bf16.msra.mxu0 %v5268_v14 }
 0x755   :  { %4289 = vmatpush3.bf16.msra.mxu1 %v5179_v3 }
 0x756   :  { %4291 = vmatprep.subr.bf16.mxu1 %v5189_v11 }
 0x759   :  { %4293 = vmatpush3.bf16.msra.mxu1 %v5189_v11 }
 0x75a   :  { %4295 = vmatprep.subr.bf16.mxu1 %v5200_v25 }
 0x80f   :  { %v3864_v34 = vpop.f32.mrb[12].mxu1 }
 0x810   :  { %v1095_v37 = vpop.f32.mrb[13].mxu1 }
 0x811   :  { %3897 = vmatprep.mubr.f32.mxu1 %v1095_v37  ;;  %v94_v37 = vld [vmem:[%s5891_s9 + $0x68] sm:$0xff] }
 0x812   :  { %3898 = vmatmul.mubr.f32.vlgmr.msra.gmra.mrb[14].mxu1 %v3864_v34  ;;  %v93_v34 = vld [vmem:[%s5891_s9 + $0x60] sm:$0xff] }
 0x813   :  { %4297 = vmatpush3.bf16.msra.mxu1 %v5200_v25  ;;  %3932 = vmatprep.mubr.f32.mxu1 %v4971_v12  ;;  %v5330_v22 = vpack.c.bf16 %v94_v37, %v93_v34  ;;  %v4359_v34 = vpack.c.bf16 %v5113_v41, %v5896_v20  ;;  %v5390_v37 = vld [vmem:[%s5894_s11] ss:$0 sm:$0xff] }
 0x814   :  { %4299 = vmatprep.subr.bf16.mxu1 %v5279_v40 }
 0x817   :  { %4301 = vmatpush3.bf16.msra.mxu1 %v5279_v40 }
 0x818   :  { %4303 = vmatprep.subr.bf16.mxu1 %v5290_v51 }
 0x81b   :  { %4305 = vmatpush3.bf16.msra.mxu1 %v5290_v51 }
 0x81c   :  { %4307 = vmatprep.subr.bf16.mxu1 %v5300_v58 }
 0x81f   :  { %4309 = vmatpush3.bf16.msra.mxu1 %v5300_v58 }
 0x820   :  { %4311 = vmatprep.subr.bf16.mxu1 %v5310_v5 }
 0x823   :  { %4313 = vmatpush3.bf16.msra.mxu1 %v5310_v5 }
 0x824   :  { %4315 = vmatprep.subr.bf16.mxu1 %v5320_v32 }
 0x827   :  { %4317 = vmatpush3.bf16.msra.mxu1 %v5320_v32 }
 0x828   :  { %4319 = vmatprep.subr.bf16.mxu1 %v5330_v22 }
 0x82b   :  { %4321 = vmatpush3.bf16.msra.mxu1 %v5330_v22 }
 0x82c   :  { %4323 = vmatprep.subr.bf16.mxu1 %v5340_v57 }
 0x82f   :  { %4325 = vmatpush3.bf16.msra.mxu1 %v5340_v57 }
 0x830   :  { %4375 = vmatprep.subr.bf16.mxu1 %v4853_v13 }
 0x832   :  { %3933 = vmatmul.mubr.f32.vlgmr.msra.gmra.mrb[14].mxu1 %v4969_v2 }
 0x833   :  { %4377 = vmatpush3.bf16.msra.mxu1 %v4853_v13  ;;  %v111_v13 = vld [vmem:[%s5892_s10 + $0x70] sm:$0xff] }
 0x834   :  { %4379 = vmatprep.subr.bf16.mxu1 %v4858_v15 }
 0x837   :  { %4381 = vmatpush3.bf16.msra.mxu1 %v4858_v15  ;;  %v112_v15 = vld [vmem:[%s5892_s10 + $0x78] sm:$0xff] }
 0x838   :  { %4383 = vmatprep.subr.bf16.mxu1 %v4869_v18 }
 0x83b   :  { %4385 = vmatpush3.bf16.msra.mxu1 %v4869_v18  ;;  %v5369_v18 = vpack.c.bf16 %v112_v15, %v111_v13 }
 0x83c   :  { %4387 = vmatprep.subr.bf16.mxu1 %v4879_v21 }
 0x83d   :  { %4355 = vmatprep.subr.bf16.mxu0 %v5369_v18 }
 0x83e   :  { %4357 = vmatpush3.bf16.msra.mxu0 %v5369_v18 }
 0x83f   :  { %4389 = vmatpush3.bf16.msra.mxu1 %v4879_v21  ;;  %v5900_v21 = vmov 0.0|0.0  }
 0x840   :  { %4391 = vmatprep.subr.bf16.mxu1 %v4889_v24  ;;  %4358 = vmatprep.subr.bf16.mxu0 %v5900_v21 }
 0x843   :  { %4393 = vmatpush3.bf16.msra.mxu1 %v4889_v24  ;;  %v5377_v24 = vld [vmem:[%s5893_s8] ss:$0 sm:$0xff] }
 0x844   :  { %4395 = vmatprep.subr.bf16.mxu1 %v4899_v27 }
 0x847   :  { %4397 = vmatpush3.bf16.msra.mxu1 %v4899_v27 }
 0x848   :  { %4399 = vmatprep.subr.bf16.mxu1 %v4909_v30 }
 0x84b   :  { %4401 = vmatpush3.bf16.msra.mxu1 %v4909_v30 }
 0x84c   :  { %4403 = vmatprep.subr.bf16.mxu1 %v4926_v35 }
 0x84f   :  { %4405 = vmatpush3.bf16.msra.mxu1 %v4926_v35 }
 0x850   :  { %4493 = vmatprep.subr.bf16.mxu1 %v5212_v38 }
 0x905   :  { %v3934_v27 = vpop.f32.mrb[14].mxu1 }
 0x906   :  { %v4538_v30 = vadd.f32 %v3934_v27, %v5377_v24  ;;  %v1251_v35 = vpop.f32.mrb[15].mxu1 }
 0x907   :  { %v4539_v61 = vadd.f32 %v5377_v24, %v1251_v35 }
 0x908   :  { %v1263_v10 = vmax.f32 %v4538_v30, 0.0 }
 0x909   :  { %v1262_v63 = vmax.f32 %v4539_v61, 0.0 }
 0x90b   :  { %3967 = vmatprep.mubr.f32.mxu0 %v1262_v63 }
 0x90c   :  { %3968 = vmatmul.mubr.f32.vlgmr.msra.gmra.mrb[2].mxu0 %v1263_v10 }
 0x90d   :  { %4361 = vmatpush3.bf16.msk.msra.mxu0 %vm4360_vm5, %v4359_v34  ;;  %3974 = vmatprep.mubr.msk.f32.mxu0 %vm4731_vm10, %v5898_v26 }
 0x90e   :  { %4362 = vmatprep.subr.bf16.mxu0 %v5900_v21 }
 0x9df   :  { %v3969_v46 = vpop.f32.mrb[2].mxu0 }
 0x9e0   :  { %v1342_v54 = vadd.f32 %v3969_v46, %v5390_v37  ;;  %v1336_v13 = vpop.f32.mrb[3].mxu0 }
 0x9e1   :  { %v1337_v15 = vadd.f32 %v5390_v37, %v1336_v13 }
 0x9e2   :  { %1800 = vst.msk [vmem:[%s5889_s14 + $0x18] sm:$0x7f] %vm1349_vm7, %v1342_v54  ;;  %v1350_v43 = vsel %vm1349_vm7, %v1342_v54, -inf }
 0x9e3   :  { %1799 = vst.msk [vmem:[%s5889_s14 + $0x10] sm:$0xff] %vm1345_vm8, %v1337_v15  ;;  %1351 = vmax.xlane.f32.xlu1 %v1350_v43  ;;  %v1346_v27 = vsel %vm1345_vm8, %v1337_v15, -inf }
 0x9e4   :  { %1347 = vmax.xlane.f32.xlu0 %v1346_v27 }
 0xa70   :  { %v1352_v30 = vpop.xlane.xlu1 %1351 }
 0xa71   :  { %v1354_v35 = vsub.f32 %v1342_v54, %v1352_v30  ;;  %v1348_v61 = vpop.xlane.xlu0 %1347 }
 0xa72   :  { %v1353_v63 = vsub.f32 %v1337_v15, %v1348_v61 }
 0xa73   :  { %v1357_v10 = vmul.f32 1.442695, %v1354_v35 }
 0xa74   :  { %v1355_v34 = vmul.f32 1.442695, %v1353_v63  ;;  %v3502_v63 = vld [vmem:[%s5881_s0 + $0x10] sm:$0xff] }
 0xa76   :  { %4632 = vpow2.f32 %v1355_v34 }
 0xa77   :  { %4634 = vpow2.f32 %v1357_v10  ;;  %v3503_v10 = vld [vmem:[%s5881_s0 + $0x18] sm:$0xff] }
 0xa80   :  { %v4633_v46 = vpop.eup %4632 }
 0xa81   :  { %v1359_v13 = vsel %vm1345_vm8, %v4633_v46, 0.0  ;;  %v4635_v20 = vpop.eup %4634 }
 0xa82   :  { %1360 = vadd.xlane.f32.xlu0 %v1359_v13  ;;  %v1362_v33 = vsel %vm1349_vm7, %v4635_v20, 0.0 }
 0xa86   :  { %1363 = vadd.xlane.f32.xlu0 %v1362_v33 }
 0xb0f   :  { %v1361_v43 = vpop.xlane.xlu0 %1360 }
 0xb10   :  { %4636 = vrcp.f32 %v1361_v43 }
 0xb13   :  { %v1364_v54 = vpop.xlane.xlu0 %1363 }
 0xb14   :  { %4638 = vrcp.f32 %v1364_v54 }
 0xb1a   :  { %v4637_v15 = vpop.eup %4636 }
 0xb1b   :  { %v5408_v27 = vmul.f32 %v4637_v15, %v4633_v46  ;;  %v4370_v46 = vpack.c.bf16 %v3503_v10, %v3502_v63 }
 0xb1d   :  { %1369 = vxpose.xlu0.b32.start [1/2] (short) (narrow) %v5408_v27, 8 }
 0xb1e   :  { %v4639_v30 = vpop.eup %4638 }
 0xb1f   :  { %v5411_v35 = vmul.f32 %v4639_v30, %v4635_v20  ;;  %v5425_v20 = vld [vmem:[%s5882_s1 + $0x4] sm:$0xf]  }
 0xb20   :  { %v3554_v34 = vunpack.c.0.s8 %v5425_v20  ;;  %v3555_v43 = vunpack.c.1.s8 %v5425_v20 }
 0xb21   :  { %1370 = vxpose.xlu0.b32.end [2/2] (short) (narrow) %v5411_v35, 8  ;;  %v4363_v33 = vpack.c.bf16 %v5411_v35, %v5408_v27 }
 0xb22   :  { %v5440_v15 = vcvt.s32.f32 %v3554_v34  ;;  %v5442_v30 = vcvt.s32.f32 %v3555_v43 }
 0xb9d   :  { %v1385_v61 = vpop.trf.xlu0 }
 0xb9e   :  { %3975 = vmatmul.mubr.msk.f32.vlgmr.msra.gmra.mrb[4].mxu0 %vm465_vm3, %v1385_v61 }
 0xb9f   :  { %4365 = vmatpush3.bf16.msk.msra.mxu0 %vm4977_vm6, %v4363_v33  ;;  %3981 = vmatprep.mubr.msk.f32.mxu0 %vm4731_vm10, %v5898_v26 }
 0xba0   :  { %4366 = vmatprep.subr.bf16.mxu0 %v5900_v21 }
 0xc71   :  { %v1472_v13 = vpop.f32.mrb[4].mxu0 }
 0xc72   :  { %v3976_v54 = vpop.f32.mrb[5].mxu0  ;;  %3982 = vmatmul.mubr.msk.f32.vlgmr.msra.gmra.mrb[6].mxu0 %vm465_vm3, %v1472_v13 }
 0xc73   :  { %4369 = vmatpush3.bf16.msk.msra.mxu0 %vm4977_vm6, %v4363_v33  ;;  %3988 = vmatprep.mubr.msk.f32.mxu0 %vm4731_vm10, %v5898_v26 }
 0xc74   :  { %4371 = vmatprep.subr.bf16.mxu0 %v4370_v46 }
 0xc76   :  { %3989 = vmatmul.mubr.msk.f32.vlgmr.msra.gmra.mrb[8].mxu0 %vm465_vm3, %v1385_v61 }
 0xc77   :  { %4373 = vmatpush3.bf16.msra.mxu0 %v4370_v46  ;;  %3995 = vmatprep.mubr.msk.f32.mxu0 %vm122_vm0, %v5440_v15 }
 0xc78   :  { %3998 = vmatprep.subr.msk.mxu0 %vm217_vm1, %v4823_v6 }
 0xc7a   :  { %3996 = vmatmul.mubr.msk.f32.vlgmr.msra.gmra.mrb[10].mxu0 %vm122_vm0, %v5442_v30 }
 0xc7b   :  { %3999 = vmatpush3.msk.msra.mxu0 %vm217_vm1, %v4823_v6 }
 0xc7c   :  { %4003 = vmatprep.subr.msk.mxu0 %vm217_vm1, %v4840_v9 }
 0xd45   :  { %v5455_v33 = vpop.f32.mrb[6].mxu0 }
 0xd46   :  { %v3983_v34 = vpop.f32.mrb[7].mxu0 }
 0xd49   :  { %v5457_v61 = vpop.f32.mrb[8].mxu0 }
 0xd4a   :  { %v3990_v46 = vpop.f32.mrb[9].mxu0 }
 0xd4d   :  { %v3997_v13 = vpop.f32.mrb[10].mxu0 }
 0xd4e   :  { %v1896_v43 = vpop.f32.mrb[11].mxu0 }
 0xd4f   :  { %4000 = vmatprep.mubr.msk.f32.mxu0 %vm210_vm2, %v1896_v43 }
 0xd50   :  { %4001 = vmatmul.mubr.msk.f32.vlgmr.msra.gmra.mrb[12].mxu0 %vm210_vm2, %v3997_v13 }
 0xd51   :  { %4004 = vmatpush3.msk.msra.mxu0 %vm217_vm1, %v4840_v9  ;;  %4005 = vmatprep.mubr.msk.f32.mxu0 %vm210_vm2, %v3502_v63  ;;  %v5918_v9 = vmov 0.0|0.0  }
 0xd58   :  { %4006 = vmatmul.mubr.msk.f32.vlgmr.msra.gmra.mrb[12].mxu0 %vm210_vm2, %v3503_v10 }
 0xe2b   :  { %v4007_v6 = vpop.f32.mrb[12].mxu0 }
 0xe2c   :  { %v4540_v54 = vadd.f32 %v4007_v6, %v4933_v36  ;;  %v2058_v34 = vpop.f32.mrb[13].mxu0 }
 0xe2d   :  { %v4541_v26 = vadd.f32 %v4933_v36, %v2058_v34 }
 0xe2e   :  { %v2070_v46 = vmax.f32 %v4540_v54, 0.0 }
 0xe2f   :  { %v2069_v21 = vmax.f32 %v4541_v26, 0.0 }
 0xe31   :  { %v4406_v12 = vpack.c.bf16 %v2070_v46, %v2069_v21  ;;  %4040 = vmatprep.mubr.f32.mxu1 %v2069_v21 }
 0xe32   :  { %4041 = vmatmul.mubr.f32.vlgmr.msra.gmra.mrb[16].mxu1 %v2070_v46 }
 0xe33   :  { %4407 = vmatprep.subr.bf16.mxu0 %v4406_v12  ;;  %4495 = vmatpush3.bf16.msra.mxu1 %v5212_v38 }
 0xe34   :  { %4409 = vmatpush3.bf16.msra.mxu0 %v4406_v12  ;;  %4497 = vmatprep.subr.bf16.mxu1 %v5217_v45 }
 0xe37   :  { %4499 = vmatpush3.bf16.msra.mxu1 %v5217_v45 }
 0xe38   :  { %4501 = vmatprep.subr.bf16.mxu1 %v5228_v50 }
 0xe3b   :  { %4503 = vmatpush3.bf16.msra.mxu1 %v5228_v50 }
 0xe3c   :  { %4505 = vmatprep.subr.bf16.mxu1 %v5238_v55 }
 0xe3f   :  { %4507 = vmatpush3.bf16.msra.mxu1 %v5238_v55 }
 0xe40   :  { %4509 = vmatprep.subr.bf16.mxu1 %v5248_v60 }
 0xe43   :  { %4511 = vmatpush3.bf16.msra.mxu1 %v5248_v60 }
 0xe44   :  { %4513 = vmatprep.subr.bf16.mxu1 %v5258_v1 }
 0xe47   :  { %4515 = vmatpush3.bf16.msra.mxu1 %v5258_v1 }
 0xe48   :  { %4517 = vmatprep.subr.bf16.mxu1 %v5268_v14 }
 0xe4b   :  { %4519 = vmatpush3.bf16.msra.mxu1 %v5268_v14 }
 0xe4c   :  { %4521 = vmatprep.subr.bf16.mxu1 %v5369_v18 }
 0xe4f   :  { %4523 = vmatpush3.bf16.msra.mxu1 %v5369_v18 }
 0xe50   :  { %4524 = vmatprep.subr.bf16.mxu1 %v5918_v9 }
 0xf05   :  { %v4042_v36 = vpop.f32.mrb[16].mxu1 }
 0xf06   :  { %v2143_v12 = vadd.f32 %v4042_v36, %v4940_v44  ;;  %v2137_v26 = vpop.f32.mrb[17].mxu1  ;;  %v4410_v36 = vunpack.c.l.s8.bf16 %v5425_v20 }
 0xf07   :  { %v2138_v38 = vadd.f32 %v4940_v44, %v2137_v26 }
 0xf08   :  { %3535 = vst.msk [vmem:[%s5888_s13 + $0x18] sm:$0xff] %vm465_vm3, %v2143_v12  ;;  %v2149_v50 = vsel %vm465_vm3, %v2143_v12, -inf  ;;  %4411 = vmatprep.subr.bf16.mxu0 %v4410_v36 }
 0xf09   :  { %3534 = vst.msk [vmem:[%s5888_s13 + $0x10] sm:$0xff] %vm465_vm3, %v2138_v38  ;;  %v2146_v45 = vsel %vm465_vm3, %v2138_v38, -inf }
 0xf0a   :  { %2147 = vmax.xlane.f32.xlu1 %v2146_v45 }
 0xf0e   :  { %2150 = vmax.xlane.f32.xlu1 %v2149_v50 }
 0xf97   :  { %v2148_v55 = vpop.xlane.xlu1 %2147 }
 0xf98   :  { %v2152_v60 = vsub.f32 %v2138_v38, %v2148_v55 }
 0xf9a   :  { %v2154_v1 = vmul.f32 1.442695, %v2152_v60 }
 0xf9b   :  { %v2151_v44 = vpop.xlane.xlu1 %2150 }
 0xf9c   :  { %4640 = vpow2.f32 %v2154_v1  ;;  %v2153_v14 = vsub.f32 %v2143_v12, %v2151_v44 }
 0xf9e   :  { %v2156_v18 = vmul.f32 1.442695, %v2153_v14 }
 0xfa0   :  { %4642 = vpow2.f32 %v2156_v18  ;;  %v5919_v18 = vsub.f32 1.0, %v5000_v29 }
 0xfa6   :  { %v4641_v21 = vpop.eup %4640 }
 0xfa7   :  { %v2158_v63 = vsel %vm465_vm3, %v4641_v21, 0.0 }
 0xfa8   :  { %2159 = vadd.xlane.f32.xlu1 %v2158_v63 }
 0xfaa   :  { %v4643_v10 = vpop.eup %4642 }
 0xfab   :  { %v2161_v13 = vsel %vm465_vm3, %v4643_v10, 0.0 }
 0xfac   :  { %2162 = vadd.xlane.f32.xlu1 %v2161_v13 }
0x1035   :  { %v2160_v43 = vpop.xlane.xlu1 %2159 }
0x1036   :  { %4644 = vrcp.f32 %v2160_v43 }
0x1039   :  { %v2163_v6 = vpop.xlane.xlu1 %2162 }
0x103a   :  { %4646 = vrcp.f32 %v2163_v6 }
0x1040   :  { %v4645_v54 = vpop.eup %4644 }
0x1041   :  { %v5497_v34 = vmul.f32 %v4645_v54, %v4641_v21 }
0x1043   :  { %2168 = vxpose.xlu1.b32.start [1/2] (short) (narrow) %v5497_v34, 16 }
0x1044   :  { %v4647_v46 = vpop.eup %4646 }
0x1045   :  { %v5501_v12 = vmul.f32 %v4647_v46, %v4643_v10 }
0x1047   :  { %2169 = vxpose.xlu1.b32.end [2/2] (short) (narrow) %v5501_v12, 16  ;;  %v4414_v26 = vpack.c.bf16 %v5501_v12, %v5497_v34 }
0x10c3   :  { %v2184_v38 = vpop.trf.xlu1 }
0x10c4   :  { %4047 = vmatprep.mubr.msk.f32.mxu0 %vm122_vm0, %v2184_v38 }
0x10c7   :  { %v2185_v45 = vpop.trf.xlu1 }
0x10c8   :  { %4048 = vmatmul.mubr.msk.f32.vlgmr.msra.gmra.mrb[14].mxu0 %vm122_vm0, %v2185_v45 }
0x10c9   :  { %4413 = vmatpush3.bf16.msra.mxu0 %v4410_v36  ;;  %4054 = vmatprep.mubr.msk.f32.mxu0 %vm122_vm0, %v2184_v38 }
0x10ca   :  { %4415 = vmatprep.subr.bf16.mxu0 %v4414_v26 }
0x10cc   :  { %4055 = vmatmul.mubr.msk.f32.vlgmr.msra.gmra.mrb[16].mxu0 %vm122_vm0, %v2185_v45 }
0x10cd   :  { %4417 = vmatpush3.bf16.msra.mxu0 %v4414_v26 }
0x10ce   :  { %4419 = vmatprep.subr.bf16.mxu0 %v4414_v26 }
0x119b   :  { %v5510_v20 = vpop.f32.mrb[14].mxu0 }
0x119c   :  { %v5512_v50 = vpop.f32.mrb[15].mxu0 }
0x119d   :  { %v4422_v55 = vpack.c.bf16 %v5510_v20, %v5512_v50 }
0x119f   :  { %v4056_v60 = vpop.f32.mrb[16].mxu0 }
0x11a0   :  { %v2347_v1 = vpop.f32.mrb[17].mxu0 }
0x11a1   :  { %4061 = vmatprep.mubr.msk.f32.mxu0 %vm122_vm0, %v2347_v1 }
0x11a2   :  { %4062 = vmatmul.mubr.msk.f32.vlgmr.msra.gmra.mrb[18].mxu0 %vm122_vm0, %v4056_v60 }
0x11a3   :  { %4421 = vmatpush3.bf16.msra.mxu0 %v4414_v26  ;;  %4068 = vmatprep.mubr.msk.f32.mxu0 %vm122_vm0, %v2184_v38 }
0x11a4   :  { %4424 = vmatprep.subr.msk.bf16.mxu0 %vm4977_vm6, %v4422_v55 }
0x11a6   :  { %4069 = vmatmul.mubr.msk.f32.vlgmr.msra.gmra.mrb[20].mxu0 %vm122_vm0, %v2185_v45  ;;  %v783_v45 = vsel %vm122_vm0, %v4825_v7, 0.0 }
0x11a7   :  { %4427 = vmatpush3.bf16.msk.msra.mxu0 %vm4977_vm6, %v4422_v55 }
0x11a8   :  { %4429 = vmatprep.subr.bf16.mxu0 %v5089_v16 }
0x1275   :  { %v4063_v44 = vpop.f32.mrb[18].mxu0 }
0x1276   :  { %v2438_v14 = vmul.f32 %v4063_v44, %v5000_v29  ;;  %v5528_v21 = vmul.f32 %v4063_v44, %v5919_v18  ;;  %v2428_v63 = vpop.f32.mrb[19].mxu0 }
0x1277   :  { %v2437_v10 = vmul.f32 %v4997_v28, %v2428_v63  ;;  %v5532_v13 = vmul.f32 %v2428_v63, %v5003_v31  ;;  %v789_v63 = vmul.f32 %v4956_v0, %v4956_v0 }
0x1278   :  { %v2616_v43 = vsel %vm771_vm9, %v5528_v21, 0.0  ;;  %v2440_v6 = vsel %vm771_vm9, %v2438_v14, 0.0  ;;  %v786_v14 = vsel %vm122_vm0, %v4827_v8, 0.0 }
0x1279   :  { %2617 = vadd.xlane.f32.xlu1 %v2616_v43  ;;  %v5537_v54 = vpop.f32.mrb[20].mxu0  ;;  %v2613_v46 = vsel %vm465_vm3, %v5532_v13, 0.0  ;;  %v2439_v36 = vsel %vm465_vm3, %v2437_v10, 0.0  ;;  %v791_v7 = vsel %vm465_vm3, %v789_v63, 0.0  ;;  %v790_v10 = vmul.f32 %v4960_v4, %v4960_v4 }
0x127a   :  { %5920 = vst [vmem:[#allocation6_spill] sm:$0xff] %v5537_v54  ;;  %v2560_v26 = vmul.f32 %v5537_v54, %v5537_v54  ;;  %2614 = vadd.xlane.f32.xlu0 %v2613_v46  ;;  %v5544_v38 = vpop.f32.mrb[21].mxu0  ;;  %v5548_v55 = vadd.f32 %v2440_v6, %v2439_v36 }
0x127b   :  { %5921 = vst [vmem:[#allocation7_spill] sm:$0xff] %v5544_v38  ;;  %v2559_v60 = vmul.f32 %v5544_v38, %v5544_v38  ;;  %v794_v43 = vsel %vm465_vm3, %v790_v10, 0.0 }
0x127c   :  { %v2562_v1 = vsel %vm771_vm9, %v2560_v26, 0.0 }
0x127d   :  { %784 = vadd.xlane.f32.xlu1 %v783_v45  ;;  %v2561_v44 = vsel %vm465_vm3, %v2559_v60, 0.0 }
0x127e   :  { %v5556_v18 = vadd.f32 %v2562_v1, %v2561_v44 }
0x1281   :  { %787 = vadd.xlane.f32.xlu1 %v786_v14 }
0x1285   :  { %792 = vadd.xlane.f32.xlu1 %v791_v7 }
0x1289   :  { %795 = vadd.xlane.f32.xlu1 %v794_v43 }
0x128d   :  { %774 = vadd.xlane.f32.xlu1 %v5025_v48 }
0x1306   :  { %v2618_v6 = vpop.xlane.xlu1 %2617 }
0x1307   :  { %4648 = vrsqrt.f32 %v2618_v6  ;;  %v2615_v8 = vpop.xlane.xlu0 %2614  ;;  %vm2628_vm1 = vcmp.eq.f32.partialorder %v2618_v6, inf  ;;  %v2631_v7 = vand.u32 2147483648, %v2618_v6  ;;  %vm2630_vm13 = vcmp.eq.f32.partialorder %v2618_v6, 0.0 }
0x1308   :  { %4650 = vrsqrt.f32 %v2615_v8  ;;  %vm2621_vm2 = vcmp.eq.f32.partialorder %v2615_v8, inf  ;;  %v2624_v4 = vand.u32 2147483648, %v2615_v8  ;;  %vm2623_vm11 = vcmp.eq.f32.partialorder %v2615_v8, 0.0 }
0x130a   :  { %v785_v46 = vpop.xlane.xlu1 %784 }
0x130e   :  { %v788_v36 = vpop.xlane.xlu1 %787 }
0x1311   :  { %v4649_v26 = vpop.eup %4648 }
0x1312   :  { %v4651_v0 = vpop.eup %4650  ;;  %v2627_v45 = vmul.f32 %v4649_v26, %v2618_v6  ;;  %v793_v60 = vpop.xlane.xlu1 %792 }
0x1313   :  { %v2620_v1 = vmul.f32 %v4651_v0, %v2615_v8  ;;  %v797_v44 = vmul.f32 %v793_v60, %v785_v46 }
0x1314   :  { %v2629_v63 = vsel %vm2628_vm1, %v2618_v6, %v2627_v45  ;;  %v1564_v6 = vsel %vm465_vm3, %v5110_v39, 0.0  ;;  %v2451_v39 = vsel %vm122_vm0, %v5440_v15, 0.0  ;;  %vm1553_vm1 = vcmask 9216  }
0x1315   :  { %v2622_v14 = vsel %vm2621_vm2, %v2615_v8, %v2620_v1  ;;  %v2632_v2 = vsel %vm2630_vm13, %v2631_v7, %v2629_v63  ;;  %v800_v26 = vsel %vm799_vm12, %v797_v44, 0.0  ;;  %v2458_v44 = vmul.f32 %v5501_v12, %v5501_v12 }
0x1316   :  { %v796_v48 = vpop.xlane.xlu1 %795  ;;  %v2625_v10 = vsel %vm2623_vm11, %v2624_v4, %v2622_v14  ;;  %v2634_v46 = vadd.f32 1e-15, %v2632_v2  ;;  %v1567_v4 = vsel %vm771_vm9, %v5113_v41, 0.0  ;;  %v1571_v2 = vmul.f32 %v5411_v35, %v5411_v35 }
0x1317   :  { %v798_v43 = vmul.f32 %v796_v48, %v788_v36  ;;  %v2633_v31 = vadd.f32 1e-15, %v2625_v10  ;;  %v2454_v41 = vsel %vm122_vm0, %v5442_v30, 0.0  ;;  %v2457_v35 = vmul.f32 %v5497_v34, %v5497_v34 }
0x1318   :  { %vm1581_vm2 = vcmask 6144  }
0x1319   :  { %2635 = vxpose.xlu0.b32.start [1/2] (short) (narrow) %v2633_v31, 8  ;;  %v801_v0 = vsel %vm799_vm12, %v798_v43, 0.0 }
0x131a   :  { %v775_v54 = vpop.xlane.xlu1 %774  ;;  %v802_v38 = vadd.f32 %v801_v0, %v800_v26 }
0x131b   :  { %v776_v23 = vrot.slane %v775_v54, 4 }
0x131c   :  { %803 = vadd.xlane.f32.xlu1 %v802_v38  ;;  %v2459_v38 = vsel %vm465_vm3, %v2457_v35, 0.0  ;;  %v5642_v35 = vmul.f32 0.2581989, %v5000_v29 }
0x131d   :  { %v777_v8 = vadd.f32 %v776_v23, %v775_v54  ;;  %2636 = vxpose.xlu0.b32.end [2/2] (short) (narrow) %v2634_v46, 8  ;;  %v1575_v23 = vsel %vm1349_vm7, %v1571_v2, 0.0 }
0x131f   :  { %v778_v45 = vrot.slane %v777_v8, 2 }
0x1320   :  { %897 = vadd.xlane.f32.xlu1 %v5033_v53  ;;  %v1570_v53 = vmul.f32 %v5408_v27, %v5408_v27  ;;  %v2462_v27 = vsel %vm465_vm3, %v2458_v44, 0.0 }
0x1321   :  { %v779_v60 = vadd.f32 %v778_v45, %v777_v8  ;;  %v5922_v8 = vmov 0.0  }
0x1322   :  { %v1572_v54 = vsel %vm1345_vm8, %v1570_v53, 0.0 }
0x1323   :  { %v780_v36 = vrot.slane %v779_v60, 1 }
0x1324   :  { %1565 = vadd.xlane.f32.xlu1 %v1564_v6 }
0x1325   :  { %v781_v1 = vadd.f32 %v780_v36, %v779_v60 }
0x1327   :  { %4553 = vpush %v781_v1 }
0x1328   :  { %1568 = vadd.xlane.f32.xlu1 %v1567_v4 }
0x132c   :  { %1576 = vadd.xlane.f32.xlu1 %v1575_v23 }
0x134a   :  { %1573 = vadd.xlane.f32.xlu0 %v1572_v54 }
0x134e   :  { %2452 = vadd.xlane.f32.xlu0 %v2451_v39 }
0x1352   :  { %2455 = vadd.xlane.f32.xlu0 %v2454_v41  ;;  %v5639_v41 = vmul.f32 0.2581989, %v4997_v28 }
0x1356   :  { %2460 = vadd.xlane.f32.xlu0 %v2459_v38 }
0x1358   :  { %s5632_s15 = spop %4553 }
0x135a   :  { %2463 = vadd.xlane.f32.xlu0 %v2462_v27 }
0x1399   :  { %v2651_v14 = vpop.trf.xlu0 }
0x139a   :  { %v2670_v15 = vrot.slane %v2651_v14, %v5093_v17 }
0x139c   :  { %4652 = vrcp.f32 %v2670_v15 }
0x139d   :  { %4654 = vrcp.f32 %v2634_v46 }
0x139e   :  { %4656 = vrcp.f32 %v2633_v31 }
0x13a6   :  { %v4653_v30 = vpop.eup %4652 }
0x13a7   :  { %v4655_v63 = vpop.eup %4654  ;;  %v2672_v34 = vmul.f32 %v4653_v30, %v5532_v13  ;;  %v2673_v7 = vmul.f32 %v4653_v30, %v5528_v21 }
0x13a8   :  { %v4657_v48 = vpop.eup %4656 }
0x13a9   :  { %v804_v10 = vpop.xlane.xlu1 %803  ;;  %v5591_v43 = vmul.f32 %v4657_v48, %v2672_v34  ;;  %v2677_v12 = vmul.f32 %v4655_v63, %v2673_v7 }
0x13aa   :  { %v805_v26 = vrot.slane %v804_v10, 4 }
0x13ab   :  { %vm2678_vm0 = vcmp.gt.f32.partialorder %v5591_v43, 0.2  ;;  %vm2679_vm14 = vcmp.gt.f32.partialorder %v2677_v12, 0.2 }
0x13ac   :  { %v806_v0 = vadd.f32 %v805_v26, %v804_v10  ;;  %v5597_v31 = vsel %vm2678_vm0, 1.0, %v5922_v8  ;;  %v5600_v46 = vsel %vm2679_vm14, 1.0, %v5922_v8  ;;  %v1552_v26 = vmul.f32 %v4997_v28, %v5455_v33  ;;  %vm4526_vm14 = vmpackc.low %vm1025_vm4, %vm2678_vm0 }
0x13ad   :  { %4075 = vmatprep.mubr.msk.f32.mxu0 %vm465_vm3, %v5597_v31  ;;  %3542 = vst.msk [vmem:[%s5889_s14 + $0x30] sm:$0xff] %vm465_vm3, %v5597_v31 }
0x13ae   :  { %3543 = vst.msk [vmem:[%s5889_s14 + $0x38] sm:$0x7f] %vm771_vm9, %v5600_v46  ;;  %v807_v21 = vrot.slane %v806_v0, 2  ;;  %4076 = vmatmul.mubr.msk.f32.vlgmr.msra.gmra.mrb[22].mxu0 %vm465_vm3, %v5600_v46  ;;  %v1554_v8 = vsel %vm1553_vm1, %v1552_v26, 0.0 }
0x13af   :  { %4431 = vmatpush3.bf16.msra.mxu0 %v5089_v16  ;;  %v898_v16 = vpop.xlane.xlu1 %897 }
0x13b0   :  { %v808_v13 = vadd.f32 %v807_v21, %v806_v0  ;;  %4433 = vmatprep.subr.bf16.mxu0 %v5115_v49 }
0x13b2   :  { %v809_v45 = vrot.slane %v808_v13, 1 }
0x13b3   :  { %4435 = vmatpush3.bf16.msra.mxu0 %v5115_v49  ;;  %v899_v49 = vrot.slane %v898_v16, 4  ;;  %v1566_v39 = vpop.xlane.xlu1 %1565 }
0x13b4   :  { %v810_v60 = vadd.f32 %v809_v45, %v808_v13  ;;  %4437 = vmatprep.subr.bf16.mxu0 %v5139_v52 }
0x13b6   :  { %4555 = vpush %v810_v60 }
0x13b7   :  { %4439 = vmatpush3.bf16.msra.mxu0 %v5139_v52  ;;  %v900_v52 = vadd.f32 %v899_v49, %v898_v16  ;;  %v1569_v14 = vpop.xlane.xlu1 %1568 }
0x13b8   :  { %4441 = vmatprep.subr.bf16.mxu0 %v5149_v56 }
0x13bb   :  { %4443 = vmatpush3.bf16.msra.mxu0 %v5149_v56  ;;  %v901_v56 = vrot.slane %v900_v52, 2  ;;  %v1577_v12 = vpop.xlane.xlu1 %1576 }
0x13bc   :  { %4445 = vmatprep.subr.bf16.mxu0 %v5159_v59 }
0x13bf   :  { %4447 = vmatpush3.bf16.msra.mxu0 %v5159_v59 }
0x13c0   :  { %4449 = vmatprep.subr.bf16.mxu0 %v5169_v62 }
0x13c3   :  { %4451 = vmatpush3.bf16.msra.mxu0 %v5169_v62  ;;  %v902_v62 = vadd.f32 %v901_v56, %v900_v52 }
0x13c4   :  { %4453 = vmatprep.subr.bf16.mxu0 %v5179_v3 }
0x13c5   :  { %v903_v6 = vrot.slane %v902_v62, 1 }
0x13c7   :  { %4455 = vmatpush3.bf16.msra.mxu0 %v5179_v3  ;;  %v904_v3 = vadd.f32 %v903_v6, %v902_v62 }
0x13c8   :  { %4457 = vmatprep.subr.bf16.mxu0 %v5189_v11 }
0x13cb   :  { %4459 = vmatpush3.bf16.msra.mxu0 %v5189_v11 }
0x13cc   :  { %4461 = vmatprep.subr.bf16.mxu0 %v5200_v25 }
0x13d7   :  { %v1574_v7 = vpop.xlane.xlu0 %1573 }
0x13e7   :  { %s4556_s16 = spop %4555 }
0x13e8   :  { %v812_v59 = vstv %s4556_s16 }
0x13e9   :  { %4658 = vrcp.f32 %v812_v59 }
0x13f3   :  { %v4659_v36 = vpop.eup %4658 }
0x13f4   :  { %4557 = vpush %v4659_v36 }
0x13f5   :  { %4559 = vpush %v904_v3 }
0x1425   :  { %s5634_s17 = spop %4557 }
0x1426   :  { %s815_s9 = smul.f32 %s5634_s17, %s5632_s15  ;;  %s4560_s18 = spop %4559 }
0x1427   :  { %v906_v11 = vstv %s4560_s18 }
0x1428   :  { %4660 = vrsqrt.f32 %v906_v11  ;;  %vm909_vm15 = vcmp.eq.f32.partialorder %v906_v11, inf  ;;  %v912_v2 = vand.u32 2147483648, %v906_v11  ;;  %vm911_vm5 = vcmp.eq.f32.partialorder %v906_v11, 0.0  ;;  %s816_s1 = ssub.f32 0.0, %s815_s9 }
0x1432   :  { %v4661_v1 = vpop.eup %4660 }
0x1433   :  { %v908_v4 = vmul.f32 %v4661_v1, %v906_v11 }
0x1435   :  { %v910_v23 = vsel %vm909_vm15, %v906_v11, %v908_v4 }
0x1436   :  { %v913_v53 = vsel %vm911_vm5, %v912_v2, %v910_v23 }
0x1437   :  { %4561 = vpush %v913_v53 }
0x1468   :  { %s4562_s19 = spop %4561 }
0x1469   :  { %v915_v54 = vstv %s4562_s19 }
0x146a   :  { %4662 = vrcp.f32 %v915_v54 }
0x1474   :  { %v4663_v38 = vpop.eup %4662 }
0x1475   :  { %v917_v44 = vmul.f32 %v4663_v38, %v5023_v47  ;;  %v918_v27 = vmul.f32 %v4663_v38, %v5016_v42  ;;  %v1578_v47 = vmul.f32 %v1574_v7, %v1566_v39  ;;  %v1579_v42 = vmul.f32 %v1577_v12, %v1569_v14 }
0x1476   :  { %v5923_v7 = vmov 1.0  }
0x1477   :  { %v921_v15 = vsub.f32 %v917_v44, %v5639_v41  ;;  %v922_v30 = vsub.f32 %v918_v27, %v5642_v35  ;;  %v1580_v21 = vsel %vm799_vm12, %v1578_v47, 0.0  ;;  %v1582_v45 = vsel %vm1581_vm2, %v1579_v42, 0.0 }
0x1478   :  { %v1583_v60 = vadd.f32 %v1582_v45, %v1580_v21 }
0x1479   :  { %v923_v63 = vmul.f32 %v921_v15, %v921_v15  ;;  %v924_v34 = vmul.f32 %v922_v30, %v922_v30 }
0x147b   :  { %v925_v48 = vsel %vm465_vm3, %v923_v63, 0.0  ;;  %v926_v10 = vsel %vm771_vm9, %v924_v34, 0.0 }
0x147c   :  { %v927_v29 = vadd.f32 %v926_v10, %v925_v48  ;;  %v4525_v48 = vpack.c.bf16 %v5600_v46, %v5923_v7  ;;  %v5682_v10 = vld [vmem:[%s5889_s14 + $0x20] sm:$0xff] }
0x147e   :  { %928 = vadd.xlane.f32.xlu1 %v927_v29 }
0x1481   :  { %v4077_v0 = vpop.f32.mrb[22].mxu0 }
0x1482   :  { %1555 = vadd.xlane.f32.xlu1 %v1554_v8  ;;  %v2757_v13 = vpop.f32.mrb[23].mxu0 }
0x1483   :  { %4110 = vmatprep.mubr.f32.mxu0 %v2757_v13 }
0x1484   :  { %4111 = vmatmul.mubr.f32.vlgmr.msra.gmra.mrb[24].mxu0 %v4077_v0  ;;  %v1668_v0 = vmul.f32 %v5457_v61, %v5457_v61 }
0x1485   :  { %4463 = vmatpush3.bf16.msra.mxu0 %v5200_v25  ;;  %4145 = vmatprep.mubr.f32.mxu0 %v5512_v50 }
0x1486   :  { %1584 = vadd.xlane.f32.xlu1 %v1583_v60  ;;  %4465 = vmatprep.subr.bf16.mxu0 %v5279_v40 }
0x1489   :  { %4467 = vmatpush3.bf16.msra.mxu0 %v5279_v40 }
0x148a   :  { %4469 = vmatprep.subr.bf16.mxu0 %v5290_v51 }
0x148d   :  { %4471 = vmatpush3.bf16.msra.mxu0 %v5290_v51 }
0x148e   :  { %4473 = vmatprep.subr.bf16.mxu0 %v5300_v58 }
0x1491   :  { %4475 = vmatpush3.bf16.msra.mxu0 %v5300_v58 }
0x1492   :  { %4477 = vmatprep.subr.bf16.mxu0 %v5310_v5 }
0x1495   :  { %4479 = vmatpush3.bf16.msra.mxu0 %v5310_v5 }
0x1496   :  { %4481 = vmatprep.subr.bf16.mxu0 %v5320_v32 }
0x1499   :  { %4483 = vmatpush3.bf16.msra.mxu0 %v5320_v32 }
0x149a   :  { %4485 = vmatprep.subr.bf16.mxu0 %v5330_v22 }
0x149d   :  { %4487 = vmatpush3.bf16.msra.mxu0 %v5330_v22 }
0x149e   :  { %4489 = vmatprep.subr.bf16.mxu0 %v5340_v57 }
0x14a1   :  { %4491 = vmatpush3.bf16.msra.mxu0 %v5340_v57 }
0x14a4   :  { %4146 = vmatmul.mubr.f32.vlgmr.msra.gmra.mrb[24].mxu0 %v5510_v20 }
0x150b   :  { %v929_v25 = vpop.xlane.xlu1 %928 }
0x150c   :  { %v930_v40 = vrot.slane %v929_v25, 4 }
0x150e   :  { %v931_v51 = vadd.f32 %v930_v40, %v929_v25 }
0x150f   :  { %v1556_v52 = vpop.xlane.xlu1 %1555 }
0x1510   :  { %v932_v58 = vrot.slane %v931_v51, 2  ;;  %v1557_v56 = vrot.slane %v1556_v52, 4 }
0x1512   :  { %v933_v16 = vadd.f32 %v932_v58, %v931_v51  ;;  %v1558_v62 = vadd.f32 %v1557_v56, %v1556_v52 }
0x1513   :  { %v1585_v32 = vpop.xlane.xlu1 %1584 }
0x1514   :  { %v934_v5 = vrot.slane %v933_v16, 1  ;;  %v1586_v59 = vrot.slane %v1585_v32, 4  ;;  %v1559_v57 = vrot.slane %v1558_v62, 2 }
0x1516   :  { %v935_v49 = vadd.f32 %v934_v5, %v933_v16  ;;  %v1587_v22 = vadd.f32 %v1586_v59, %v1585_v32  ;;  %v1560_v3 = vadd.f32 %v1559_v57, %v1558_v62 }
0x1518   :  { %4563 = vpush %v935_v49  ;;  %v1588_v36 = vrot.slane %v1587_v22, 2  ;;  %v1561_v4 = vrot.slane %v1560_v3, 1 }
0x151a   :  { %v1589_v11 = vadd.f32 %v1588_v36, %v1587_v22  ;;  %v1562_v38 = vadd.f32 %v1561_v4, %v1560_v3  ;;  %v2453_v4 = vpop.xlane.xlu0 %2452 }
0x151c   :  { %v1590_v23 = vrot.slane %v1589_v11, 1 }
0x151e   :  { %v1591_v44 = vadd.f32 %v1590_v23, %v1589_v11  ;;  %v2456_v23 = vpop.xlane.xlu0 %2455 }
0x1549   :  { %s4564_s20 = spop %4563 }
0x154a   :  { %v937_v6 = vstv %s4564_s20 }
0x154b   :  { %4664 = vrsqrt.f32 %v937_v6  ;;  %vm940_vm11 = vcmp.eq.f32.partialorder %v937_v6, inf  ;;  %v943_v53 = vand.u32 2147483648, %v937_v6  ;;  %vm942_vm13 = vcmp.eq.f32.partialorder %v937_v6, 0.0 }
0x1555   :  { %v4665_v1 = vpop.eup %4664 }
0x1556   :  { %v939_v2 = vmul.f32 %v4665_v1, %v937_v6 }
0x1558   :  { %v941_v54 = vsel %vm940_vm11, %v937_v6, %v939_v2 }
0x1559   :  { %v944_v39 = vsel %vm942_vm13, %v943_v53, %v941_v54  ;;  %v2461_v53 = vpop.xlane.xlu0 %2460  ;;  %v5711_v54 = vmul.f32 0.70710677, %v4997_v28 }
0x155a   :  { %4565 = vpush %v944_v39 }
0x155b   :  { %4567 = vpush %v1562_v38 }
0x155c   :  { %4569 = vpush %v1591_v44 }
0x1577   :  { %v4147_v27 = vpop.f32.mrb[24].mxu0 }
0x1578   :  { %v4542_v14 = vadd.f32 %v4147_v27, %v5377_v24  ;;  %v2907_v15 = vpop.f32.mrb[25].mxu0  ;;  %v2464_v27 = vpop.xlane.xlu0 %2463 }
0x1579   :  { %v4543_v30 = vadd.f32 %v5377_v24, %v2907_v15  ;;  %v2466_v15 = vmul.f32 %v2464_v27, %v2456_v23 }
0x157a   :  { %v2919_v34 = vmax.f32 %v4542_v14, 0.0 }
0x157b   :  { %v2918_v63 = vmax.f32 %v4543_v30, 0.0 }
0x157d   :  { %4180 = vmatprep.mubr.f32.mxu1 %v2918_v63  ;;  %v2465_v63 = vmul.f32 %v2461_v53, %v2453_v4 }
0x157e   :  { %4181 = vmatmul.mubr.f32.vlgmr.msra.gmra.mrb[18].mxu1 %v2919_v34  ;;  %v2468_v34 = vsel %vm799_vm12, %v2466_v15, 0.0 }
0x157f   :  { %4527 = vmatpush3.bf16.msk.msra.mxu1 %vm4526_vm14, %v4525_v48  ;;  %4187 = vmatprep.mubr.msk.f32.mxu1 %vm4731_vm10, %v5682_v10  ;;  %v2467_v7 = vsel %vm799_vm12, %v2465_v63, 0.0  ;;  %vm1812_vm14 = vcmask 24576   ;;  %v1810_v63 = vstv %s816_s1 }
0x1580   :  { %4528 = vmatprep.subr.bf16.mxu1 %v5918_v9 }
0x158b   :  { %s5687_s8 = spop %4565 }
0x158c   :  { %s5689_s10 = spop %4567 }
0x158d   :  { %s4570_s3 = spop %4569 }
0x158e   :  { %v1593_v24 = vstv %s4570_s3 }
0x158f   :  { %4666 = vrcp.f32 %v1593_v24  ;;  %v2469_v24 = vadd.f32 %v2468_v34, %v2467_v7 }
0x1599   :  { %v4667_v43 = vpop.eup %4666 }
0x159a   :  { %4571 = vpush %v4667_v43  ;;  %v3211_v43 = vsel %vm465_vm3, %v5597_v31, 0.0 }
0x15cb   :  { %s5708_s6 = spop %4571 }
0x15cc   :  { %s1596_s26 = smul.f32 %s5708_s6, %s5689_s10 }
0x15ce   :  { %s1597_s0 = ssub.f32 0.0, %s1596_s26 }
0x1651   :  { %v4182_v12 = vpop.f32.mrb[18].mxu1 }
0x1652   :  { %v2992_v29 = vadd.f32 %v4182_v12, %v5390_v37  ;;  %v2986_v26 = vpop.f32.mrb[19].mxu1 }
0x1653   :  { %v2987_v47 = vadd.f32 %v5390_v37, %v2986_v26  ;;  %v1669_v37 = vsel %vm1553_vm1, %v1668_v0, 0.0  ;;  %v3214_v26 = vsel %vm771_vm9, %v5600_v46, 0.0 }
0x1654   :  { %3545 = vst.msk [vmem:[%s5889_s14 + $0x48] sm:$0x7f] %vm1349_vm7, %v2992_v29  ;;  %v2998_v42 = vsel %vm1349_vm7, %v2992_v29, -inf }
0x1655   :  { %3544 = vst.msk [vmem:[%s5889_s14 + $0x40] sm:$0xff] %vm1345_vm8, %v2987_v47  ;;  %2999 = vmax.xlane.f32.xlu1 %v2998_v42  ;;  %v2995_v8 = vsel %vm1345_vm8, %v2987_v47, -inf }
0x1659   :  { %2996 = vmax.xlane.f32.xlu1 %v2995_v8 }
0x165d   :  { %1670 = vadd.xlane.f32.xlu1 %v1669_v37 }
0x16e2   :  { %v3000_v21 = vpop.xlane.xlu1 %2999 }
0x16e3   :  { %v3002_v13 = vsub.f32 %v2992_v29, %v3000_v21 }
0x16e5   :  { %v3005_v25 = vmul.f32 1.442695, %v3002_v13 }
0x16e6   :  { %v2997_v45 = vpop.xlane.xlu1 %2996 }
0x16e7   :  { %v3001_v60 = vsub.f32 %v2987_v47, %v2997_v45 }
0x16e9   :  { %v3003_v40 = vmul.f32 1.442695, %v3001_v60 }
0x16ea   :  { %v1671_v51 = vpop.xlane.xlu1 %1670 }
0x16eb   :  { %4668 = vpow2.f32 %v3003_v40  ;;  %v1672_v58 = vrot.slane %v1671_v51, 4 }
0x16ec   :  { %4670 = vpow2.f32 %v3005_v25 }
0x16ed   :  { %v1673_v16 = vadd.f32 %v1672_v58, %v1671_v51 }
0x16ef   :  { %v1674_v5 = vrot.slane %v1673_v16, 2 }
0x16f1   :  { %v1675_v49 = vadd.f32 %v1674_v5, %v1673_v16 }
0x16f3   :  { %v1676_v52 = vrot.slane %v1675_v49, 1 }
0x16f5   :  { %v4669_v32 = vpop.eup %4668  ;;  %v1677_v56 = vadd.f32 %v1676_v52, %v1675_v49 }
0x16f6   :  { %v3007_v59 = vsel %vm1345_vm8, %v4669_v32, 0.0  ;;  %v4671_v62 = vpop.eup %4670 }
0x16f7   :  { %3008 = vadd.xlane.f32.xlu1 %v3007_v59  ;;  %4573 = vpush %v1677_v56  ;;  %v3010_v22 = vsel %vm1349_vm7, %v4671_v62, 0.0 }
0x16fb   :  { %3011 = vadd.xlane.f32.xlu1 %v3010_v22 }
0x1728   :  { %s4574_s7 = spop %4573 }
0x1729   :  { %v1679_v6 = vstv %s4574_s7 }
0x172a   :  { %4672 = vrsqrt.f32 %v1679_v6  ;;  %vm1682_vm0 = vcmp.eq.f32.partialorder %v1679_v6, inf  ;;  %v1685_v3 = vand.u32 2147483648, %v1679_v6  ;;  %vm1684_vm15 = vcmp.eq.f32.partialorder %v1679_v6, 0.0 }
0x1734   :  { %v4673_v57 = vpop.eup %4672 }
0x1735   :  { %v1681_v36 = vmul.f32 %v4673_v57, %v1679_v6 }
0x1737   :  { %v1683_v11 = vsel %vm1682_vm0, %v1679_v6, %v1681_v36 }
0x1738   :  { %v1686_v1 = vsel %vm1684_vm15, %v1685_v3, %v1683_v11 }
0x1739   :  { %4575 = vpush %v1686_v1 }
0x176a   :  { %s4576_s24 = spop %4575 }
0x176b   :  { %v1688_v2 = vstv %s4576_s24 }
0x176c   :  { %4674 = vrcp.f32 %v1688_v2 }
0x1776   :  { %v4675_v39 = vpop.eup %4674 }
0x1777   :  { %v1690_v38 = vmul.f32 %v4675_v39, %v5457_v61 }
0x1779   :  { %v1692_v44 = vsub.f32 %v1690_v38, %v5711_v54  ;;  %v5924_v38 = vld [vmem:[#allocation4_spill] sm:$0xff] }
0x177a   :  { %vm1804_vm5 = vcmp.eq.s32.totalorder %v5924_v38, 2  ;;  %vm1803_vm11 = vcmp.eq.s32.totalorder %v5924_v38, 1  ;;  %vm1802_vm13 = vcmp.eq.s32.totalorder %v5924_v38, 0 }
0x177b   :  { %v1693_v14 = vmul.f32 %v1692_v44, %v1692_v44  ;;  %v1805_v44 = vstv %s1597_s0 }
0x177d   :  { %v1694_v30 = vsel %vm1553_vm1, %v1693_v14, 0.0  ;;  %v1808_v14 = vstv %s5687_s8 }
0x177e   :  { %1695 = vadd.xlane.f32.xlu0 %v1694_v30 }
0x1782   :  { %2442 = vadd.xlane.f32.xlu0 %v5548_v55 }
0x1784   :  { %v3009_v48 = vpop.xlane.xlu1 %3008 }
0x1785   :  { %4676 = vrcp.f32 %v3009_v48 }
0x1786   :  { %2470 = vadd.xlane.f32.xlu0 %v2469_v24 }
0x1788   :  { %v3012_v61 = vpop.xlane.xlu1 %3011 }
0x1789   :  { %4678 = vrcp.f32 %v3012_v61 }
0x178a   :  { %2564 = vadd.xlane.f32.xlu0 %v5556_v18 }
0x178e   :  { %3212 = vadd.xlane.f32.xlu0 %v3211_v43 }
0x178f   :  { %v4677_v12 = vpop.eup %4676 }
0x1790   :  { %v3014_v29 = vmul.f32 %v4677_v12, %v4669_v32 }
0x1792   :  { %3215 = vadd.xlane.f32.xlu0 %v3214_v26  ;;  %3017 = vxpose.xlu1.b32.start [1/2] (short) (narrow) %v3014_v29, 8  ;;  %v3217_v55 = vmul.f32 %v3014_v29, %v3014_v29 }
0x1793   :  { %v4679_v47 = vpop.eup %4678 }
0x1794   :  { %v3219_v42 = vsel %vm1345_vm8, %v3217_v55, 0.0  ;;  %v3016_v0 = vmul.f32 %v4679_v47, %v4671_v62 }
0x1796   :  { %3220 = vadd.xlane.f32.xlu0 %v3219_v42  ;;  %3018 = vxpose.xlu1.b32.end [2/2] (short) (narrow) %v3016_v0, 8  ;;  %v3218_v8 = vmul.f32 %v3016_v0, %v3016_v0  ;;  %v5725_v18 = vpack.c.bf16 %v3016_v0, %v3014_v29 }
0x1798   :  { %v3222_v31 = vsel %vm1349_vm7, %v3218_v8, 0.0 }
0x179a   :  { %3223 = vadd.xlane.f32.xlu0 %v3222_v31 }
0x180b   :  { %v1696_v37 = vpop.xlane.xlu0 %1695 }
0x180c   :  { %v1697_v21 = vrot.slane %v1696_v37, 4 }
0x180e   :  { %v1698_v13 = vadd.f32 %v1697_v21, %v1696_v37 }
0x180f   :  { %v2443_v51 = vpop.xlane.xlu0 %2442 }
0x1810   :  { %v1699_v45 = vrot.slane %v1698_v13, 2  ;;  %v2444_v16 = vrot.slane %v2443_v51, 4 }
0x1812   :  { %v5728_v46 = vpop.trf.xlu1  ;;  %v1700_v60 = vadd.f32 %v1699_v45, %v1698_v13  ;;  %v2445_v49 = vadd.f32 %v2444_v16, %v2443_v51  ;;  %v5926_v51 = vld [vmem:[#allocation6_spill] sm:$0xff] }
0x1813   :  { %4188 = vmatmul.mubr.msk.f32.vlgmr.msra.gmra.mrb[20].mxu1 %vm465_vm3, %v5728_v46  ;;  %v2471_v58 = vpop.xlane.xlu0 %2470 }
0x1814   :  { %4531 = vmatpush3.bf16.msk.msra.mxu1 %vm4977_vm6, %v5725_v18  ;;  %v1701_v25 = vrot.slane %v1700_v60, 1  ;;  %4194 = vmatprep.mubr.msk.f32.mxu1 %vm4731_vm10, %v5682_v10  ;;  %v2472_v5 = vrot.slane %v2471_v58, 4  ;;  %v2446_v56 = vrot.slane %v2445_v49, 2 }
0x1815   :  { %4532 = vmatprep.subr.bf16.mxu1 %v5918_v9 }
0x1816   :  { %v1702_v40 = vadd.f32 %v1701_v25, %v1700_v60  ;;  %v2473_v52 = vadd.f32 %v2472_v5, %v2471_v58  ;;  %v2447_v62 = vadd.f32 %v2446_v56, %v2445_v49  ;;  %v5925_v25 = vld [vmem:[#allocation7_spill] sm:$0xff] }
0x1817   :  { %v2565_v23 = vpop.xlane.xlu0 %2564 }
0x1818   :  { %4577 = vpush %v1702_v40  ;;  %v2474_v59 = vrot.slane %v2473_v52, 2  ;;  %v2448_v57 = vrot.slane %v2447_v62, 1  ;;  %v2566_v53 = vrot.slane %v2565_v23, 4 }
0x181a   :  { %v2475_v22 = vadd.f32 %v2474_v59, %v2473_v52  ;;  %v2449_v4 = vadd.f32 %v2448_v57, %v2447_v62  ;;  %v2567_v39 = vadd.f32 %v2566_v53, %v2565_v23 }
0x181b   :  { %v3213_v37 = vpop.xlane.xlu0 %3212 }
0x181c   :  { %v2476_v36 = vrot.slane %v2475_v22, 1  ;;  %v2568_v15 = vrot.slane %v2567_v39, 2 }
0x181e   :  { %v2477_v2 = vadd.f32 %v2476_v36, %v2475_v22  ;;  %v2569_v24 = vadd.f32 %v2568_v15, %v2567_v39 }
0x181f   :  { %v3216_v13 = vpop.xlane.xlu0 %3215 }
0x1820   :  { %v2570_v61 = vrot.slane %v2569_v24, 1 }
0x1822   :  { %v2571_v12 = vadd.f32 %v2570_v61, %v2569_v24 }
0x1823   :  { %v3221_v45 = vpop.xlane.xlu0 %3220 }
0x1827   :  { %v3224_v16 = vpop.xlane.xlu0 %3223 }
0x1849   :  { %s4578_s25 = spop %4577 }
0x184a   :  { %v1704_v32 = vstv %s4578_s25 }
0x184b   :  { %4680 = vrsqrt.f32 %v1704_v32  ;;  %vm1707_vm7 = vcmp.eq.f32.partialorder %v1704_v32, inf  ;;  %v1710_v3 = vand.u32 2147483648, %v1704_v32  ;;  %vm1709_vm8 = vcmp.eq.f32.partialorder %v1704_v32, 0.0 }
0x1855   :  { %v4681_v6 = vpop.eup %4680 }
0x1856   :  { %v1706_v9 = vmul.f32 %v4681_v6, %v1704_v32 }
0x1858   :  { %v1708_v11 = vsel %vm1707_vm7, %v1704_v32, %v1706_v9 }
0x1859   :  { %v1711_v1 = vsel %vm1709_vm8, %v1710_v3, %v1708_v11 }
0x185a   :  { %4579 = vpush %v1711_v1 }
0x185b   :  { %4581 = vpush %v2449_v4 }
0x185c   :  { %4583 = vpush %v2477_v2 }
0x188b   :  { %s4580_s27 = spop %4579 }
0x188c   :  { %v1806_v27 = vstv %s4580_s27  ;;  %s5746_s28 = spop %4581 }
0x188d   :  { %v1807_v30 = vsel %vm1804_vm5, %v1805_v44, %v1806_v27  ;;  %s4584_s13 = spop %4583 }
0x188e   :  { %v1809_v34 = vsel %vm1803_vm11, %v1808_v14, %v1807_v30  ;;  %v2479_v7 = vstv %s4584_s13 }
0x188f   :  { %v1811_v48 = vsel %vm1802_vm13, %v1810_v63, %v1809_v34  ;;  %4682 = vrcp.f32 %v2479_v7 }
0x1890   :  { %1813 = vst.msk [vmem:[%s5889_s14 + $0x28] sm:$0x1] %vm1812_vm14, %v1811_v48 }
0x1899   :  { %v4683_v43 = vpop.eup %4682 }
0x189a   :  { %4585 = vpush %v4683_v43 }
0x189b   :  { %4587 = vpush %v2571_v12 }
0x18cb   :  { %s5759_s30 = spop %4585 }
0x18cc   :  { %s2482_s15 = smul.f32 %s5759_s30, %s5746_s28  ;;  %s4588_s16 = spop %4587 }
0x18cd   :  { %v2573_v29 = vstv %s4588_s16 }
0x18ce   :  { %4684 = vrsqrt.f32 %v2573_v29  ;;  %vm2576_vm0 = vcmp.eq.f32.partialorder %v2573_v29, inf  ;;  %v2579_v47 = vand.u32 2147483648, %v2573_v29  ;;  %vm2578_vm15 = vcmp.eq.f32.partialorder %v2573_v29, 0.0  ;;  %s2483_s22 = ssub.f32 0.0, %s2482_s15 }
0x18d8   :  { %v4685_v26 = vpop.eup %4684 }
0x18d9   :  { %v2575_v55 = vmul.f32 %v4685_v26, %v2573_v29 }
0x18db   :  { %v2577_v42 = vsel %vm2576_vm0, %v2573_v29, %v2575_v55 }
0x18dc   :  { %v2580_v0 = vsel %vm2578_vm15, %v2579_v47, %v2577_v42 }
0x18dd   :  { %4589 = vpush %v2580_v0 }
0x18e6   :  { %v3120_v8 = vpop.f32.mrb[20].mxu1 }
0x18e7   :  { %v4189_v31 = vpop.f32.mrb[21].mxu1  ;;  %4195 = vmatmul.mubr.msk.f32.vlgmr.msra.gmra.mrb[22].mxu1 %vm465_vm3, %v3120_v8 }
0x18e8   :  { %4535 = vmatpush3.bf16.msk.msra.mxu1 %vm4977_vm6, %v5725_v18  ;;  %4201 = vmatprep.mubr.msk.f32.mxu1 %vm4731_vm10, %v5682_v10  ;;  %v3226_v10 = vmul.f32 %v3224_v16, %v3216_v13 }
0x18ea   :  { %v3228_v59 = vsel %vm1581_vm2, %v3226_v10, 0.0 }
0x18eb   :  { %4202 = vmatmul.mubr.msk.f32.vlgmr.msra.gmra.mrb[24].mxu1 %vm465_vm3, %v5728_v46  ;;  %v3225_v46 = vmul.f32 %v3221_v45, %v3213_v37 }
0x18ed   :  { %v3227_v62 = vsel %vm799_vm12, %v3225_v46, 0.0 }
0x18ee   :  { %v3229_v22 = vadd.f32 %v3228_v59, %v3227_v62  ;;  %v5927_v62 = vld [vmem:[#allocation2_spill] sm:$0xff] }
0x190e   :  { %s4590_s17 = spop %4589 }
0x190f   :  { %v2582_v21 = vstv %s4590_s17 }
0x1910   :  { %4686 = vrcp.f32 %v2582_v21 }
0x191a   :  { %v4687_v60 = vpop.eup %4686 }
0x191b   :  { %v2584_v40 = vmul.f32 %v4687_v60, %v5925_v25  ;;  %v2585_v58 = vmul.f32 %v4687_v60, %v5926_v51 }
0x191d   :  { %v2586_v19 = vsub.f32 %v2584_v40, %v5639_v41  ;;  %v2587_v18 = vsub.f32 %v2585_v58, %v5642_v35 }
0x191f   :  { %v2588_v5 = vmul.f32 %v2586_v19, %v2586_v19  ;;  %v2589_v49 = vmul.f32 %v2587_v18, %v2587_v18 }
0x1921   :  { %v2590_v52 = vsel %vm465_vm3, %v2588_v5, 0.0  ;;  %v2591_v32 = vsel %vm771_vm9, %v2589_v49, 0.0 }
0x1922   :  { %v2592_v56 = vadd.f32 %v2591_v32, %v2590_v52 }
0x1924   :  { %2593 = vadd.xlane.f32.xlu0 %v2592_v56 }
0x1928   :  { %3230 = vadd.xlane.f32.xlu0 %v3229_v22  ;;  %v1767_v22 = vsel %vm1025_vm4, %v5927_v62, -inf }
0x19b1   :  { %v2594_v6 = vpop.xlane.xlu0 %2593 }
0x19b2   :  { %v2595_v41 = vrot.slane %v2594_v6, 4 }
0x19b4   :  { %v2596_v57 = vadd.f32 %v2595_v41, %v2594_v6  ;;  %v3412_v6 = vsel %vm1025_vm4, %v5510_v20, -inf  ;;  %v5928_v41 = vld [vmem:[#allocation3_spill] sm:$0xff] }
0x19b5   :  { %v3231_v34 = vpop.xlane.xlu0 %3230 }
0x19b6   :  { %v2597_v35 = vrot.slane %v2596_v57, 2  ;;  %v3232_v7 = vrot.slane %v3231_v34, 4 }
0x19b8   :  { %v2598_v9 = vadd.f32 %v2597_v35, %v2596_v57  ;;  %v3233_v48 = vadd.f32 %v3232_v7, %v3231_v34  ;;  %v5929_v57 = vld [vmem:[#allocation5_spill] sm:$0xff] }
0x19b9   :  { %v5807_v35 = vmul.f32 %v5455_v33, %v5929_v57 }
0x19ba   :  { %v5779_v36 = vpop.f32.mrb[22].mxu1  ;;  %v2599_v3 = vrot.slane %v2598_v9, 1  ;;  %v3234_v24 = vrot.slane %v3233_v48, 2 }
0x19bb   :  { %v3200_v11 = vmul.f32 %v4997_v28, %v5779_v36  ;;  %v4196_v1 = vpop.f32.mrb[23].mxu1 }
0x19bc   :  { %v2600_v4 = vadd.f32 %v2599_v3, %v2598_v9  ;;  %v3235_v29 = vadd.f32 %v3234_v24, %v3233_v48  ;;  %v1714_v9 = vsel %vm1553_vm1, %v5807_v35, 0.0 }
0x19bd   :  { %v3201_v2 = vsel %vm1553_vm1, %v3200_v11, 0.0 }
0x19be   :  { %4591 = vpush %v2600_v4  ;;  %3202 = vadd.xlane.f32.xlu1 %v3201_v2  ;;  %v5784_v23 = vpop.f32.mrb[24].mxu1  ;;  %v3236_v47 = vrot.slane %v3235_v29, 1 }
0x19bf   :  { %v3314_v53 = vmul.f32 %v5784_v23, %v5784_v23  ;;  %v4203_v39 = vpop.f32.mrb[25].mxu1 }
0x19c0   :  { %v3237_v8 = vadd.f32 %v3236_v47, %v3235_v29 }
0x19c1   :  { %v3315_v44 = vsel %vm1553_vm1, %v3314_v53, 0.0 }
0x19c2   :  { %3316 = vadd.xlane.f32.xlu0 %v3315_v44 }
0x19ef   :  { %s4592_s9 = spop %4591 }
0x19f0   :  { %v2602_v27 = vstv %s4592_s9 }
0x19f1   :  { %4688 = vrsqrt.f32 %v2602_v27  ;;  %vm2605_vm3 = vcmp.eq.f32.partialorder %v2602_v27, inf  ;;  %v2608_v15 = vand.u32 2147483648, %v2602_v27  ;;  %vm2607_vm6 = vcmp.eq.f32.partialorder %v2602_v27, 0.0 }
0x19fb   :  { %v4689_v14 = vpop.eup %4688 }
0x19fc   :  { %v2604_v28 = vmul.f32 %v4689_v14, %v2602_v27 }
0x19fe   :  { %v2606_v30 = vsel %vm2605_vm3, %v2602_v27, %v2604_v28 }
0x19ff   :  { %v2609_v63 = vsel %vm2607_vm6, %v2608_v15, %v2606_v30 }
0x1a00   :  { %4593 = vpush %v2609_v63 }
0x1a31   :  { %s5789_s18 = spop %4593 }
0x1a4b   :  { %v3203_v61 = vpop.xlane.xlu1 %3202 }
0x1a4c   :  { %v3204_v43 = vrot.slane %v3203_v61, 4 }
0x1a4e   :  { %v3205_v12 = vadd.f32 %v3204_v43, %v3203_v61 }
0x1a4f   :  { %v3317_v31 = vpop.xlane.xlu0 %3316 }
0x1a50   :  { %v3206_v26 = vrot.slane %v3205_v12, 2  ;;  %v3318_v37 = vrot.slane %v3317_v31, 4 }
0x1a52   :  { %v3207_v55 = vadd.f32 %v3206_v26, %v3205_v12  ;;  %v3319_v21 = vadd.f32 %v3318_v37, %v3317_v31 }
0x1a54   :  { %v3208_v42 = vrot.slane %v3207_v55, 1  ;;  %v3320_v13 = vrot.slane %v3319_v21, 2 }
0x1a56   :  { %v3209_v0 = vadd.f32 %v3208_v42, %v3207_v55  ;;  %v3321_v60 = vadd.f32 %v3320_v13, %v3319_v21 }
0x1a58   :  { %4595 = vpush %v3209_v0  ;;  %v3322_v25 = vrot.slane %v3321_v60, 1 }
0x1a59   :  { %4597 = vpush %v3237_v8 }
0x1a5a   :  { %v3323_v51 = vadd.f32 %v3322_v25, %v3321_v60 }
0x1a89   :  { %s5791_s19 = spop %4595 }
0x1a8a   :  { %s4598_s20 = spop %4597 }
0x1a8b   :  { %v3239_v45 = vstv %s4598_s20 }
0x1a8c   :  { %4690 = vrcp.f32 %v3239_v45 }
0x1a96   :  { %v4691_v40 = vpop.eup %4690 }
0x1a97   :  { %4599 = vpush %v4691_v40 }
0x1a98   :  { %4601 = vpush %v3323_v51 }
0x1ac8   :  { %s5793_s5 = spop %4599 }
0x1ac9   :  { %s3242_s2 = smul.f32 %s5793_s5, %s5791_s19  ;;  %s4602_s8 = spop %4601 }
0x1aca   :  { %v3325_v58 = vstv %s4602_s8 }
0x1acb   :  { %4692 = vrsqrt.f32 %v3325_v58  ;;  %vm3328_vm9 = vcmp.eq.f32.partialorder %v3325_v58, inf  ;;  %v3331_v18 = vand.u32 2147483648, %v3325_v58  ;;  %vm3330_vm10 = vcmp.eq.f32.partialorder %v3325_v58, 0.0  ;;  %s3243_s21 = ssub.f32 0.0, %s3242_s2 }
0x1ad5   :  { %v4693_v16 = vpop.eup %4692 }
0x1ad6   :  { %v3327_v19 = vmul.f32 %v4693_v16, %v3325_v58 }
0x1ad8   :  { %v3329_v10 = vsel %vm3328_vm9, %v3325_v58, %v3327_v19 }
0x1ad9   :  { %v3332_v5 = vsel %vm3330_vm10, %v3331_v18, %v3329_v10  ;;  %v3450_v10 = vstv %s3243_s21 }
0x1ada   :  { %4603 = vpush %v3332_v5 }
0x1b0b   :  { %s4604_s10 = spop %4603 }
0x1b0c   :  { %v3334_v49 = vstv %s4604_s10 }
0x1b0d   :  { %4694 = vrcp.f32 %v3334_v49  ;;  %v3453_v49 = vstv %s5789_s18 }
0x1b17   :  { %v4695_v46 = vpop.eup %4694 }
0x1b18   :  { %v3336_v52 = vmul.f32 %v4695_v46, %v5784_v23 }
0x1b1a   :  { %v3337_v32 = vsub.f32 %v3336_v52, %v5711_v54  ;;  %v5812_v54 = vmul.f32 %v5779_v36, %v5929_v57  ;;  %v3455_v52 = vstv %s2483_s22 }
0x1b1c   :  { %v3338_v56 = vmul.f32 %v3337_v32, %v3337_v32  ;;  %v3359_v3 = vsel %vm1553_vm1, %v5812_v54, 0.0 }
0x1b1e   :  { %v3339_v59 = vsel %vm1553_vm1, %v3338_v56, 0.0 }
0x1b1f   :  { %3340 = vadd.xlane.f32.xlu0 %v3339_v59 }
0x1b23   :  { %1768 = vmax.xlane.f32.xlu0 %v1767_v22 }
0x1b27   :  { %3413 = vmax.xlane.f32.xlu0 %v3412_v6 }
0x1b2b   :  { %1765 = vmax.xlane.f32.xlu0 %v5928_v41 }
0x1b2f   :  { %3410 = vmax.xlane.f32.xlu0 %v5512_v50 }
0x1b33   :  { %1715 = vadd.xlane.f32.xlu0 %v1714_v9 }
0x1b37   :  { %3360 = vadd.xlane.f32.xlu0 %v3359_v3 }
0x1bac   :  { %v3341_v11 = vpop.xlane.xlu0 %3340 }
0x1bad   :  { %v3342_v1 = vrot.slane %v3341_v11, 4 }
0x1baf   :  { %v3343_v4 = vadd.f32 %v3342_v1, %v3341_v11 }
0x1bb0   :  { %v1769_v2 = vpop.xlane.xlu0 %1768 }
0x1bb1   :  { %v3344_v33 = vrot.slane %v3343_v4, 2  ;;  %v5819_v44 = vsub.f32 %v5927_v62, %v1769_v2 }
0x1bb3   :  { %v3345_v23 = vadd.f32 %v3344_v33, %v3343_v4  ;;  %v1774_v28 = vmul.f32 1.442695, %v5819_v44 }
0x1bb4   :  { %v3414_v53 = vpop.xlane.xlu0 %3413 }
0x1bb5   :  { %v3346_v39 = vrot.slane %v3345_v23, 1  ;;  %v5830_v34 = vsub.f32 %v5510_v20, %v3414_v53 }
0x1bb7   :  { %v3347_v36 = vadd.f32 %v3346_v39, %v3345_v23  ;;  %v3419_v24 = vmul.f32 1.442695, %v5830_v34 }
0x1bb8   :  { %v1766_v27 = vpop.xlane.xlu0 %1765 }
0x1bb9   :  { %v5822_v14 = vsub.f32 %v5928_v41, %v1766_v27  ;;  %4605 = vpush %v3347_v36 }
0x1bbb   :  { %v1772_v15 = vmul.f32 1.442695, %v5822_v14 }
0x1bbc   :  { %v3411_v30 = vpop.xlane.xlu0 %3410 }
0x1bbd   :  { %4696 = vpow2.f32 %v1772_v15  ;;  %v5827_v63 = vsub.f32 %v5512_v50, %v3411_v30 }
0x1bbe   :  { %4698 = vpow2.f32 %v1774_v28 }
0x1bbf   :  { %v3417_v48 = vmul.f32 1.442695, %v5827_v63 }
0x1bc0   :  { %v1716_v7 = vpop.xlane.xlu0 %1715 }
0x1bc1   :  { %4700 = vrsqrt.f32 %v1716_v7  ;;  %vm1719_vm12 = vcmp.eq.f32.partialorder %v1716_v7, inf  ;;  %v1722_v26 = vand.u32 2147483648, %v1716_v7  ;;  %vm1721_vm2 = vcmp.eq.f32.partialorder %v1716_v7, 0.0 }
0x1bc2   :  { %4702 = vpow2.f32 %v3417_v48 }
0x1bc3   :  { %4704 = vpow2.f32 %v3419_v24 }
0x1bc4   :  { %v3361_v31 = vpop.xlane.xlu0 %3360 }
0x1bc5   :  { %v3367_v16 = vand.u32 2147483648, %v3361_v31  ;;  %vm3366_vm0 = vcmp.eq.f32.partialorder %v3361_v31, 0.0 }
0x1bc7   :  { %v4697_v61 = vpop.eup %4696 }
0x1bc8   :  { %v4699_v43 = vpop.eup %4698  ;;  %1776 = vadd.xlane.f32.xlu1 %v4697_v61 }
0x1bc9   :  { %v1778_v12 = vsel %vm1025_vm4, %v4699_v43, 0.0 }
0x1bcb   :  { %v4701_v29 = vpop.eup %4700 }
0x1bcc   :  { %1779 = vadd.xlane.f32.xlu1 %v1778_v12  ;;  %v1718_v50 = vmul.f32 %v4701_v29, %v1716_v7  ;;  %v4703_v20 = vpop.eup %4702 }
0x1bcd   :  { %v4705_v47 = vpop.eup %4704 }
0x1bce   :  { %v1720_v55 = vsel %vm1719_vm12, %v1716_v7, %v1718_v50  ;;  %v3423_v8 = vsel %vm1025_vm4, %v4705_v47, 0.0  ;;  %vm3364_vm4 = vcmp.eq.f32.partialorder %v3361_v31, inf }
0x1bcf   :  { %v1723_v42 = vsel %vm1721_vm2, %v1722_v26, %v1720_v55 }
0x1bd0   :  { %3421 = vadd.xlane.f32.xlu1 %v4703_v20  ;;  %v1724_v0 = vadd.f32 1e-15, %v1723_v42 }
0x1bd2   :  { %1725 = vxpose.xlu0.b32.start.end [1/1] (short) (narrow) %v1724_v0, 8 }
0x1bd4   :  { %3424 = vadd.xlane.f32.xlu1 %v3423_v8 }
0x1bea   :  { %s4606_s3 = spop %4605 }
0x1beb   :  { %v3349_v37 = vstv %s4606_s3 }
0x1bec   :  { %4706 = vrsqrt.f32 %v3349_v37  ;;  %vm3352_vm7 = vcmp.eq.f32.partialorder %v3349_v37, inf  ;;  %v3355_v60 = vand.u32 2147483648, %v3349_v37  ;;  %vm3354_vm8 = vcmp.eq.f32.partialorder %v3349_v37, 0.0 }
0x1bed   :  { %4708 = vrsqrt.f32 %v3361_v31 }
0x1bf6   :  { %v4707_v21 = vpop.eup %4706 }
0x1bf7   :  { %v3351_v13 = vmul.f32 %v4707_v21, %v3349_v37  ;;  %v4709_v45 = vpop.eup %4708 }
0x1bf8   :  { %v3363_v51 = vmul.f32 %v4709_v45, %v3361_v31 }
0x1bf9   :  { %v3353_v25 = vsel %vm3352_vm7, %v3349_v37, %v3351_v13 }
0x1bfa   :  { %v3356_v40 = vsel %vm3354_vm8, %v3355_v60, %v3353_v25  ;;  %v3365_v58 = vsel %vm3364_vm4, %v3361_v31, %v3363_v51 }
0x1bfb   :  { %4607 = vpush %v3356_v40  ;;  %v3368_v19 = vsel %vm3366_vm0, %v3367_v16, %v3365_v58 }
0x1bfc   :  { %v3369_v18 = vadd.f32 1e-15, %v3368_v19 }
0x1c07   :  { %3370 = vxpose.xlu1.b32.start.end [1/1] (short) (narrow) %v3369_v18, 8 }
0x1c2c   :  { %s4608_s23 = spop %4607 }
0x1c2d   :  { %v3451_v5 = vstv %s4608_s23 }
0x1c2e   :  { %v3452_v46 = vsel %vm1804_vm5, %v3450_v10, %v3451_v5 }
0x1c2f   :  { %v3454_v32 = vsel %vm1803_vm11, %v3453_v49, %v3452_v46 }
0x1c30   :  { %v3456_v56 = vsel %vm1802_vm13, %v3455_v52, %v3454_v32 }
0x1c31   :  { %3547 = vst.msk [vmem:[%s5889_s14 + $0x58] sm:$0x1] %vm1812_vm14, %v3456_v56 }
0x1c52   :  { %v1741_v59 = vpop.trf.xlu0 }
0x1c53   :  { %v1760_v62 = vrot.slane %v1741_v59, %v5093_v17 }
0x1c55   :  { %v1777_v22 = vpop.xlane.xlu1 %1776  ;;  %4710 = vrcp.f32 %v1760_v62 }
0x1c56   :  { %4712 = vlog2.f32 %v1777_v22 }
0x1c57   :  { %4714 = vrcp.f32 %v1724_v0 }
0x1c59   :  { %v1780_v6 = vpop.xlane.xlu1 %1779 }
0x1c5a   :  { %4716 = vlog2.f32 %v1780_v6 }
0x1c5d   :  { %v3422_v41 = vpop.xlane.xlu1 %3421 }
0x1c5e   :  { %4718 = vlog2.f32 %v3422_v41 }
0x1c5f   :  { %v4711_v57 = vpop.eup %4710 }
0x1c60   :  { %v4713_v9 = vpop.eup %4712  ;;  %v1762_v38 = vmul.f32 %v4711_v57, %v5807_v35 }
0x1c61   :  { %v3425_v3 = vpop.xlane.xlu1 %3424  ;;  %v4715_v11 = vpop.eup %4714  ;;  %v1782_v1 = vmul.f32 0.6931472, %v4713_v9 }
0x1c62   :  { %4720 = vlog2.f32 %v3425_v3  ;;  %v1764_v4 = vmul.f32 %v4715_v11, %v1762_v38 }
0x1c63   :  { %v1785_v33 = vsub.f32 %v5822_v14, %v1782_v1 }
0x1c64   :  { %v4717_v2 = vpop.eup %4716  ;;  %1801 = vst.msk [vmem:[%s5889_s14 + $0x20] sm:$0x3] %vm1553_vm1, %v1764_v4 }
0x1c65   :  { %v1784_v23 = vmul.f32 0.6931472, %v4717_v2  ;;  %1787 = vst [vmem:[%s5895_s12] sm:$0xff] %v1785_v33 }
0x1c67   :  { %v1786_v35 = vsub.f32 %v5819_v44, %v1784_v23 }
0x1c68   :  { %v4719_v53 = vpop.eup %4718 }
0x1c69   :  { %1788 = vst [vmem:[%s5895_s12 + $0x8] sm:$0x7f] %v1786_v35  ;;  %v3427_v39 = vmul.f32 0.6931472, %v4719_v53 }
0x1c6b   :  { %v3430_v36 = vsub.f32 %v5827_v63, %v3427_v39 }
0x1c6c   :  { %v4721_v27 = vpop.eup %4720 }
0x1c6d   :  { %3532 = vst [vmem:[%s5895_s12 + $0x10] sm:$0xff] %v3430_v36  ;;  %v3429_v14 = vmul.f32 0.6931472, %v4721_v27 }
0x1c6f   :  { %v3431_v28 = vsub.f32 %v5830_v34, %v3429_v14 }
0x1c71   :  { %3533 = vst [vmem:[%s5895_s12 + $0x18] sm:$0x7f] %v3431_v28 }
0x1c87   :  { %v3386_v44 = vpop.trf.xlu1 }
0x1c88   :  { %v3405_v15 = vrot.slane %v3386_v44, %v5093_v17 }
0x1c8a   :  { %4722 = vrcp.f32 %v3405_v15 }
0x1c8b   :  { %4724 = vrcp.f32 %v3369_v18 }
0x1c94   :  { %v4723_v30 = vpop.eup %4722 }
0x1c95   :  { %v3407_v63 = vmul.f32 %v4723_v30, %v5812_v54  ;;  %v4725_v7 = vpop.eup %4724 }
0x1c97   :  { %v3409_v48 = vmul.f32 %v4725_v7, %v3407_v63 }
0x1c99   :  { %3546 = vst.msk [vmem:[%s5889_s14 + $0x50] sm:$0x3] %vm1553_vm1, %v3409_v48 }

</bundles_post_ra>
